<compile_context>
chip_gen: v7x
topology: tpu7x:2x2x1
jax: 0.10.0
libtpu: 0.0.40
codegen_flags: <defaults>
</compile_context>

<pallas_src>
from functools import partial

import jax
import jax.numpy as jnp
from jax.experimental import pallas as pl
from jax.experimental.pallas import tpu as pltpu

DROPOUT_P = 0.1       # config['dropout']
_NEG_INF = -1e30      # bias for padded action lanes (exp underflows to exactly 0)


def _round_up(n, m):
    return (n + m - 1) // m * m


def _hash_u32(x):
    """lowbias32-style integer hash; stateless, pure VPU integer ops."""
    x = x ^ (x >> 16)
    x = x * jnp.uint32(0x7FEB352D)
    x = x ^ (x >> 15)
    x = x * jnp.uint32(0x846CA68B)
    x = x ^ (x >> 16)
    return x


def policy_kernel(seed_ref, x_ref, w1_ref, b1_ref, w2_ref, b2_ref,
                  w3_ref, b3_ref, o_ref, *, p, h1, h2, tb):
    """Fused MLP forward: (Linear->Dropout->ReLU) x2 -> Linear -> Softmax(dim=1)."""
    x = x_ref[...]

    if p > 0.0:
        # One fused batch of random bits for both dropout masks; counters are
        # unique per (global row, feature) so every batch tile gets fresh bits.
        seed = seed_ref[0, 0].astype(jnp.uint32)
        total = h1 + h2
        row0 = (pl.program_id(0) * tb).astype(jnp.uint32)
        rows = jax.lax.broadcasted_iota(jnp.uint32, (tb, total), 0) + row0
        cols = jax.lax.broadcasted_iota(jnp.uint32, (tb, total), 1)
        ctr = rows * jnp.uint32(total) + cols
        bits = _hash_u32(ctr ^ (seed * jnp.uint32(0x9E3779B9)))
        thr = jnp.uint32(int(p * (2 ** 32)))          # keep prob = 1 - p
        keep1 = bits[:, :h1] >= thr
        keep2 = bits[:, h1:] >= thr
        inv_keep = jnp.float32(1.0 / (1.0 - p))

    # Hidden layer 1: Linear -> Dropout -> ReLU  (order matches nn.Sequential)
    h = jnp.dot(x, w1_ref[...], preferred_element_type=jnp.float32) + b1_ref[...]
    if p > 0.0:
        h = jnp.where(keep1, h * inv_keep, 0.0)
    h = jnp.maximum(h, 0.0)

    # Hidden layer 2: Linear -> Dropout -> ReLU
    h = jnp.dot(h, w2_ref[...], preferred_element_type=jnp.float32) + b2_ref[...]
    if p > 0.0:
        h = jnp.where(keep2, h * inv_keep, 0.0)
    h = jnp.maximum(h, 0.0)

    # Output layer + softmax over the (lane-dense, padded) action axis.
    logits = jnp.dot(h, w3_ref[...], preferred_element_type=jnp.float32) + b3_ref[...]
    z = logits - jnp.max(logits, axis=-1, keepdims=True)
    e = jnp.exp(z)
    s = jnp.sum(e, axis=-1, keepdims=True)
    # TODO(synk): on hardware, e * pl.reciprocal(s, approx=True) moves this to the
    # otherwise-idle EUP slot; plain divide kept for interpret-mode portability.
    o_ref[...] = e / s


def policy_forward(x, params, seed, p=DROPOUT_P, block_batch=128):
    """Wrapper: pad features to lane-dense widths, tile the batch over a 1-D grid."""
    (w1, b1), (w2, b2), (w3, b3) = params
    B, S = x.shape
    H1, H2, A = w1.shape[1], w2.shape[1], w3.shape[1]

    # Lane-dense padding of feature axes (multiples of 128); math stays exact:
    # padded weight columns/rows are zero, padded output bias is -1e30.
    H1p, H2p, Ap = _round_up(H1, 128), _round_up(H2, 128), _round_up(A, 128)
    w1p = jnp.pad(w1, ((0, 0), (0, H1p - H1)))
    b1p = jnp.pad(b1, ((0, 0), (0, H1p - H1)))
    w2p = jnp.pad(w2, ((0, H1p - H1), (0, H2p - H2)))
    b2p = jnp.pad(b2, ((0, 0), (0, H2p - H2)))
    w3p = jnp.pad(w3, ((0, H2p - H2), (0, Ap - A)))
    b3p = jnp.pad(b3, ((0, 0), (0, Ap - A)), constant_values=_NEG_INF)

    # Batch tiling: TB rows per grid step (multiple of 8 sublanes).
    TB = min(block_batch, _round_up(B, 8))
    Bp = _round_up(B, TB)
    xp = jnp.pad(x, ((0, Bp - B), (0, 0)))
    seed_arr = jnp.asarray(seed, dtype=jnp.int32).reshape(1, 1)

    out = pl.pallas_call(
        partial(policy_kernel, p=float(p), h1=H1p, h2=H2p, tb=TB),
        out_shape=jax.ShapeDtypeStruct((Bp, Ap), jnp.float32),
        grid=(Bp // TB,),
        in_specs=[
            pl.BlockSpec((1, 1), lambda i: (0, 0)),       # seed
            pl.BlockSpec((TB, S), lambda i: (i, 0)),      # x   (batch-tiled)
            pl.BlockSpec((S, H1p), lambda i: (0, 0)),     # w1  (resident)
            pl.BlockSpec((1, H1p), lambda i: (0, 0)),     # b1
            pl.BlockSpec((H1p, H2p), lambda i: (0, 0)),   # w2
            pl.BlockSpec((1, H2p), lambda i: (0, 0)),     # b2
            pl.BlockSpec((H2p, Ap), lambda i: (0, 0)),    # w3
            pl.BlockSpec((1, Ap), lambda i: (0, 0)),      # b3
        ],
        out_specs=pl.BlockSpec((TB, Ap), lambda i: (i, 0)),
        compiler_params=pltpu.CompilerParams(
            dimension_semantics=("parallel",)),           # free 2x on v7x megacore
    )(seed_arr, xp, w1p, b1p, w2p, b2p, w3p, b3p)

    return out[:B, :A]


def init_linear(key, fan_in, fan_out):
    """Deterministic PyTorch-style init: U(-1/sqrt(fan_in), 1/sqrt(fan_in))."""
    kw, kb = jax.random.split(key)
    bound = 1.0 / jnp.sqrt(jnp.float32(fan_in))
    w = jax.random.uniform(kw, (fan_in, fan_out), jnp.float32, -bound, bound)
    b = jax.random.uniform(kb, (1, fan_out), jnp.float32, -bound, bound)
    return w, b


def ref_forward_no_dropout(x, params):
    (w1, b1), (w2, b2), (w3, b3) = params
    h = jnp.maximum(x @ w1 + b1, 0.0)
    h = jnp.maximum(h @ w2 + b2, 0.0)
    return jax.nn.softmax(h @ w3 + b3, axis=1)


if __name__ == "__main__":
    # Shapes implied by the module: state_space=8, hidden_layer_sizes=[32, 32],
    # action_space=4.  Batch chosen large enough to exercise the batch grid.
    STATE, H1, H2, ACTIONS, BATCH = 8, 32, 32, 4, 256

    key = jax.random.PRNGKey(0)
    kx, k1, k2, k3 = jax.random.split(key, 4)

    x = jax.random.normal(kx, (BATCH, STATE), jnp.float32)
    params = (
        init_linear(k1, STATE, H1),
        init_linear(k2, H1, H2),
        init_linear(k3, H2, ACTIONS),
    )

    # Training-mode forward (dropout active); grid = (BATCH // 128,) = (2,).
    probs = policy_forward(x, params, seed=0, p=DROPOUT_P)
    jax.block_until_ready(probs)
    assert probs.shape == (BATCH, ACTIONS)
    assert bool(jnp.all(jnp.isfinite(probs)))
    assert bool(jnp.allclose(jnp.sum(probs, axis=1), 1.0, atol=1e-5))

    # With dropout disabled the kernel must match a pure-JAX reference.
    probs_eval = policy_forward(x, params, seed=0, p=0.0)
    ref = ref_forward_no_dropout(x, params)
    jax.block_until_ready(probs_eval)
    assert bool(jnp.allclose(probs_eval, ref, atol=1e-5, rtol=1e-5))

    print("KERNEL_OK")
</pallas_src>

<mosaic_0001>
module attributes {stable_mosaic.version = 11 : i64} {
  func.func @policy_kernel(%arg0: i32, %arg1: memref<1x1xi32, #tpu.memory_space<vmem>>, %arg2: memref<128x8xf32, #tpu.memory_space<vmem>>, %arg3: memref<8x128xf32, #tpu.memory_space<vmem>>, %arg4: memref<1x128xf32, #tpu.memory_space<vmem>>, %arg5: memref<128x128xf32, #tpu.memory_space<vmem>>, %arg6: memref<1x128xf32, #tpu.memory_space<vmem>>, %arg7: memref<128x128xf32, #tpu.memory_space<vmem>>, %arg8: memref<1x128xf32, #tpu.memory_space<vmem>>, %arg9: memref<128x128xf32, #tpu.memory_space<vmem>>) attributes {dimension_semantics = [#tpu.dimension_semantics<parallel>], iteration_bounds = array<i64: 2>, scalar_prefetch = 0 : i64, scratch_operands = 0 : i64, tpu.core_type = #tpu.core_type<tc>, window_params = [{pipeline_mode = #tpu.pipeline_mode<synchronous>, transform_indices = @transform_0, window_bounds = array<i64: 1, 1>}, {transform_indices = @transform_1, window_bounds = array<i64: 128, 8>}, {pipeline_mode = #tpu.pipeline_mode<synchronous>, transform_indices = @transform_2, window_bounds = array<i64: 8, 128>}, {pipeline_mode = #tpu.pipeline_mode<synchronous>, transform_indices = @transform_3, window_bounds = array<i64: 1, 128>}, {pipeline_mode = #tpu.pipeline_mode<synchronous>, transform_indices = @transform_4, window_bounds = array<i64: 128, 128>}, {pipeline_mode = #tpu.pipeline_mode<synchronous>, transform_indices = @transform_5, window_bounds = array<i64: 1, 128>}, {pipeline_mode = #tpu.pipeline_mode<synchronous>, transform_indices = @transform_6, window_bounds = array<i64: 128, 128>}, {pipeline_mode = #tpu.pipeline_mode<synchronous>, transform_indices = @transform_7, window_bounds = array<i64: 1, 128>}, {transform_indices = @transform_8, window_bounds = array<i64: 128, 128>}]} {
    %c0 = arith.constant 0 : index
    %c0_0 = arith.constant 0 : index
    %0 = vector.load %arg2[%c0, %c0_0] : memref<128x8xf32, #tpu.memory_space<vmem>>, vector<128x8xf32>
    %c0_1 = arith.constant 0 : index
    %c0_2 = arith.constant 0 : index
    %1 = vector.load %arg1[%c0_1, %c0_2] : memref<1x1xi32, #tpu.memory_space<vmem>>, vector<1x1xi32>
    %2 = vector.extract %1[0, 0] : i32 from vector<1x1xi32>
    %c128_i32 = arith.constant 128 : i32
    %3 = arith.muli %arg0, %c128_i32 : i32
    %4 = tpu.iota {dimensions = array<i32: 0>} : vector<128x256xi32>
    %5 = vector.broadcast %3 : i32 to vector<128x256xi32>
    %6 = arith.addi %4, %5 : vector<128x256xi32>
    %7 = tpu.iota {dimensions = array<i32: 1>} : vector<128x256xi32>
    %c256_i32 = arith.constant 256 : i32
    %8 = vector.broadcast %c256_i32 : i32 to vector<128x256xi32>
    %9 = arith.muli %6, %8 : vector<128x256xi32>
    %10 = arith.addi %9, %7 : vector<128x256xi32>
    %c-1640531527_i32 = arith.constant -1640531527 : i32
    %11 = arith.muli %2, %c-1640531527_i32 : i32
    %12 = vector.broadcast %11 : i32 to vector<128x256xi32>
    %13 = arith.xori %10, %12 : vector<128x256xi32>
    %c16_i32 = arith.constant 16 : i32
    %14 = vector.broadcast %c16_i32 : i32 to vector<128x256xi32>
    %15 = arith.shrui %13, %14 : vector<128x256xi32>
    %16 = arith.xori %13, %15 : vector<128x256xi32>
    %c2146121005_i32 = arith.constant 2146121005 : i32
    %17 = vector.broadcast %c2146121005_i32 : i32 to vector<128x256xi32>
    %18 = arith.muli %16, %17 : vector<128x256xi32>
    %c15_i32 = arith.constant 15 : i32
    %19 = vector.broadcast %c15_i32 : i32 to vector<128x256xi32>
    %20 = arith.shrui %18, %19 : vector<128x256xi32>
    %21 = arith.xori %18, %20 : vector<128x256xi32>
    %c-2073254261_i32 = arith.constant -2073254261 : i32
    %22 = vector.broadcast %c-2073254261_i32 : i32 to vector<128x256xi32>
    %23 = arith.muli %21, %22 : vector<128x256xi32>
    %c16_i32_3 = arith.constant 16 : i32
    %24 = vector.broadcast %c16_i32_3 : i32 to vector<128x256xi32>
    %25 = arith.shrui %23, %24 : vector<128x256xi32>
    %26 = arith.xori %23, %25 : vector<128x256xi32>
    %27 = vector.extract_strided_slice %26 {offsets = [0, 0], sizes = [128, 128], strides = [1, 1]} : vector<128x256xi32> to vector<128x128xi32>
    %c429496729_i32 = arith.constant 429496729 : i32
    %28 = vector.broadcast %c429496729_i32 : i32 to vector<128x128xi32>
    %29 = arith.cmpi uge, %27, %28 : vector<128x128xi32>
    %30 = vector.extract_strided_slice %26 {offsets = [0, 128], sizes = [128, 128], strides = [1, 1]} : vector<128x256xi32> to vector<128x128xi32>
    %c429496729_i32_4 = arith.constant 429496729 : i32
    %31 = vector.broadcast %c429496729_i32_4 : i32 to vector<128x128xi32>
    %32 = arith.cmpi uge, %30, %31 : vector<128x128xi32>
    %c0_5 = arith.constant 0 : index
    %c0_6 = arith.constant 0 : index
    %33 = vector.load %arg3[%c0_5, %c0_6] : memref<8x128xf32, #tpu.memory_space<vmem>>, vector<8x128xf32>
    %cst = arith.constant dense<0.000000e+00> : vector<128x128xf32>
    %34 = tpu.matmul %0, %33, %cst {dimension_numbers = #tpu.dot_dimension_numbers<[1], [0], [0], [1], [0, 0, 1, 1], [], []>} : vector<128x8xf32>, vector<8x128xf32>, vector<128x128xf32> -> vector<128x128xf32>
    %c0_7 = arith.constant 0 : index
    %c0_8 = arith.constant 0 : index
    %35 = vector.load %arg4[%c0_7, %c0_8] : memref<1x128xf32, #tpu.memory_space<vmem>>, vector<1x128xf32>
    %36 = vector.broadcast %35 : vector<1x128xf32> to vector<128x128xf32>
    %37 = arith.addf %34, %36 : vector<128x128xf32>
    %cst_9 = arith.constant 1.11111116 : f32
    %38 = vector.broadcast %cst_9 : f32 to vector<128x128xf32>
    %39 = arith.mulf %37, %38 : vector<128x128xf32>
    %cst_10 = arith.constant 0.000000e+00 : f32
    %40 = vector.broadcast %cst_10 : f32 to vector<128x128xf32>
    %41 = arith.select %29, %39, %40 : vector<128x128xi1>, vector<128x128xf32>
    %cst_11 = arith.constant 0.000000e+00 : f32
    %42 = vector.broadcast %cst_11 : f32 to vector<128x128xf32>
    %43 = arith.maximumf %41, %42 : vector<128x128xf32>
    %c0_12 = arith.constant 0 : index
    %c0_13 = arith.constant 0 : index
    %44 = vector.load %arg5[%c0_12, %c0_13] : memref<128x128xf32, #tpu.memory_space<vmem>>, vector<128x128xf32>
    %cst_14 = arith.constant dense<0.000000e+00> : vector<128x128xf32>
    %45 = tpu.matmul %43, %44, %cst_14 {dimension_numbers = #tpu.dot_dimension_numbers<[1], [0], [0], [1], [0, 0, 1, 1], [], []>} : vector<128x128xf32>, vector<128x128xf32>, vector<128x128xf32> -> vector<128x128xf32>
    %c0_15 = arith.constant 0 : index
    %c0_16 = arith.constant 0 : index
    %46 = vector.load %arg6[%c0_15, %c0_16] : memref<1x128xf32, #tpu.memory_space<vmem>>, vector<1x128xf32>
    %47 = vector.broadcast %46 : vector<1x128xf32> to vector<128x128xf32>
    %48 = arith.addf %45, %47 : vector<128x128xf32>
    %cst_17 = arith.constant 1.11111116 : f32
    %49 = vector.broadcast %cst_17 : f32 to vector<128x128xf32>
    %50 = arith.mulf %48, %49 : vector<128x128xf32>
    %cst_18 = arith.constant 0.000000e+00 : f32
    %51 = vector.broadcast %cst_18 : f32 to vector<128x128xf32>
    %52 = arith.select %32, %50, %51 : vector<128x128xi1>, vector<128x128xf32>
    %cst_19 = arith.constant 0.000000e+00 : f32
    %53 = vector.broadcast %cst_19 : f32 to vector<128x128xf32>
    %54 = arith.maximumf %52, %53 : vector<128x128xf32>
    %c0_20 = arith.constant 0 : index
    %c0_21 = arith.constant 0 : index
    %55 = vector.load %arg7[%c0_20, %c0_21] : memref<128x128xf32, #tpu.memory_space<vmem>>, vector<128x128xf32>
    %cst_22 = arith.constant dense<0.000000e+00> : vector<128x128xf32>
    %56 = tpu.matmul %54, %55, %cst_22 {dimension_numbers = #tpu.dot_dimension_numbers<[1], [0], [0], [1], [0, 0, 1, 1], [], []>} : vector<128x128xf32>, vector<128x128xf32>, vector<128x128xf32> -> vector<128x128xf32>
    %c0_23 = arith.constant 0 : index
    %c0_24 = arith.constant 0 : index
    %57 = vector.load %arg8[%c0_23, %c0_24] : memref<1x128xf32, #tpu.memory_space<vmem>>, vector<1x128xf32>
    %58 = vector.broadcast %57 : vector<1x128xf32> to vector<128x128xf32>
    %59 = arith.addf %56, %58 : vector<128x128xf32>
    %cst_25 = arith.constant dense<0xFF800000> : vector<128xf32>
    %60 = vector.multi_reduction <maximumf>, %59, %cst_25 [1] : vector<128x128xf32> to vector<128xf32>
    %61 = vector.shape_cast %60 : vector<128xf32> to vector<128x1xf32>
    %62 = vector.broadcast %61 : vector<128x1xf32> to vector<128x128xf32>
    %63 = arith.subf %59, %62 : vector<128x128xf32>
    %64 = math.exp %63 : vector<128x128xf32>
    %cst_26 = arith.constant dense<0.000000e+00> : vector<128xf32>
    %65 = vector.multi_reduction <add>, %64, %cst_26 [1] : vector<128x128xf32> to vector<128xf32>
    %66 = vector.shape_cast %65 : vector<128xf32> to vector<128x1xf32>
    %67 = vector.broadcast %66 : vector<128x1xf32> to vector<128x128xf32>
    %68 = arith.divf %64, %67 : vector<128x128xf32>
    %c0_27 = arith.constant 0 : index
    %c0_28 = arith.constant 0 : index
    %69 = vector.load %arg9[%c0_27, %c0_28] : memref<128x128xf32, #tpu.memory_space<vmem>>, vector<128x128xf32>
    tpu.vector_store %arg9[%c0_27, %c0_28], %68 {strides = array<i32>} : memref<128x128xf32, #tpu.memory_space<vmem>>, vector<128x128xf32>,
    return
  }
  func.func @transform_0(%arg0: i32) -> (i32, i32) {
    %c0_i32 = arith.constant 0 : i32
    %c0_i32_0 = arith.constant 0 : i32
    %c0_i32_1 = arith.constant 0 : i32
    return %c0_i32, %c0_i32_0 : i32, i32
  }
  func.func @transform_1(%arg0: i32) -> (i32, i32) {
    %c0_i32 = arith.constant 0 : i32
    %c0_i32_0 = arith.constant 0 : i32
    return %arg0, %c0_i32 : i32, i32
  }
  func.func @transform_2(%arg0: i32) -> (i32, i32) {
    %c0_i32 = arith.constant 0 : i32
    %c0_i32_0 = arith.constant 0 : i32
    %c0_i32_1 = arith.constant 0 : i32
    return %c0_i32, %c0_i32_0 : i32, i32
  }
  func.func @transform_3(%arg0: i32) -> (i32, i32) {
    %c0_i32 = arith.constant 0 : i32
    %c0_i32_0 = arith.constant 0 : i32
    %c0_i32_1 = arith.constant 0 : i32
    return %c0_i32, %c0_i32_0 : i32, i32
  }
  func.func @transform_4(%arg0: i32) -> (i32, i32) {
    %c0_i32 = arith.constant 0 : i32
    %c0_i32_0 = arith.constant 0 : i32
    %c0_i32_1 = arith.constant 0 : i32
    return %c0_i32, %c0_i32_0 : i32, i32
  }
  func.func @transform_5(%arg0: i32) -> (i32, i32) {
    %c0_i32 = arith.constant 0 : i32
    %c0_i32_0 = arith.constant 0 : i32
    %c0_i32_1 = arith.constant 0 : i32
    return %c0_i32, %c0_i32_0 : i32, i32
  }
  func.func @transform_6(%arg0: i32) -> (i32, i32) {
    %c0_i32 = arith.constant 0 : i32
    %c0_i32_0 = arith.constant 0 : i32
    %c0_i32_1 = arith.constant 0 : i32
    return %c0_i32, %c0_i32_0 : i32, i32
  }
  func.func @transform_7(%arg0: i32) -> (i32, i32) {
    %c0_i32 = arith.constant 0 : i32
    %c0_i32_0 = arith.constant 0 : i32
    %c0_i32_1 = arith.constant 0 : i32
    return %c0_i32, %c0_i32_0 : i32, i32
  }
  func.func @transform_8(%arg0: i32) -> (i32, i32) {
    %c0_i32 = arith.constant 0 : i32
    %c0_i32_0 = arith.constant 0 : i32
    return %arg0, %c0_i32 : i32, i32
  }
}

</mosaic_0001>

<bundles_post_ra>
// kernel: tpu_custom_call.1
= control target key start
LH: loop header
LB: loop body
LE: loop exit
PB: predicated region body
PF: predicated region fallthrough
CT: control target
= control target key end

     0   :  { %s2831_s0 = inlined_call_operand.<no memory space> [shape: s32[1,1], index: 0, kind: input, shape index: {}]   ;;  %s2832_s1 = inlined_call_operand.vmem [shape: f32[256,8], index: 1, kind: input, shape index: {}]   ;;  %s2833_s2 = inlined_call_operand.vmem [shape: f32[8,128], index: 2, kind: input, shape index: {}]   ;;  %s2834_s3 = inlined_call_operand.vmem [shape: f32[1,128], index: 3, kind: input, shape index: {}]   ;;  %s2835_s4 = inlined_call_operand.vmem [shape: f32[128,128], index: 4, kind: input, shape index: {}]   ;;  %s2836_s5 = inlined_call_operand.vmem [shape: f32[1,128], index: 5, kind: input, shape index: {}]   ;;  %s2837_s6 = inlined_call_operand.vmem [shape: f32[128,128], index: 6, kind: input, shape index: {}]   ;;  %s2838_s7 = inlined_call_operand.vmem [shape: f32[1,128], index: 7, kind: input, shape index: {}]   ;;  %s2839_s8 = inlined_call_operand.hbm [shape: f32[256,128], index: 8, kind: output, shape index: {}]  }
   0x1   :  { %v13_v0 = vstv %s2831_s0 }
   0x2   :  { %14 = vst [vmem:[#allocation2] sm:$0x1] %v13_v0 }
   0x3   :  { %15 = vsyncpa [#allocation4], 0 }
   0x4   :  { %17 = vsyncpa [#allocation4 + $0x1], 0  ;;  %s2143_s29 = smov 0   ;;  %s2145_s30 = smov 0  }
   0x5   :  { %s2147_s9 = smov 0   ;;  %s2149_s10 = smov 0  }
   0x6 LB: > { %s2164_s0 = sadd.s32 4294967295, %s2090_s10   ;;  %s1605_s11 = sadd.s32 4294967294, %s2090_s10   ;;  %s2090_s10 = sphi %s2149_s10, %s2861_s10   ;;  %s2086_s9 = sphi %s2147_s9, %s2860_s9   ;;  %s2082_s30 = sphi %s2145_s30, %s2859_s30   ;;  %s2078_s29 = sphi %s2143_s29, %s2858_s29  }
   0x7   : > { %s2168_s12 = sadd.s32 1, %s2090_s10   ;;  %s203_s13 = sadd.s32 1, %s2086_s9 }
   0x8   : > { %s200_s14 = ssub.s32 %s2090_s10, %s2168_s12  ;;  %p213_p0 = scmp.ne.s32.totalorder %s2086_s9, %s2082_s30 }
   0x9   : > { %p201_p1 = scmp.eq.s32.totalorder %s200_s14, 0  ;;  %p214_p2 = scmp.eq.s32.totalorder %s2164_s0, 1 }
   0xa   : > { %p219_p3 = scmp.ne.s32.totalorder %s2082_s30, %s2078_s29  ;;  %p220_p4 = scmp.eq.s32.totalorder %s1605_s11, 1 }
   0xb   : > { %s2179_s15 = scalar_select %p201_p1, %s2086_s9, %s203_s13  }
   0xc   : > { %p2181_p5 = por %p214_p2, %p213_p0  ;;  %p2185_p6 = por %p220_p4, %p219_p3 }
   0xd   : > { %p1608_p7 = scmp.ge.s32.totalorder %s2090_s10, 1  ;;  %p268_p8 = scmp.lt.s32.totalorder %s2090_s10, 3 }
   0xf   : > { %p269_p9 = pnand %p1608_p7, %p268_p8 }
  0x10   : > { %v735_v1 = vld [vmem:[%s2833_s2] sm:$0xff] (!%p269_p9)  ;;  %s1610_s20 = sshll.u32 (!%p269_p9), %s2164_s0, 4  ;;  %v986_v4 = vld [vmem:[%s2835_s4 + $0x8] sm:$0xff] (!%p269_p9)  ;;  %v987_v5 = vld [vmem:[%s2835_s4 + $0x10] sm:$0xff] (!%p269_p9)  ;;  %vm743_vm0 = vcmask (!%p269_p9), 64512   ;;  %v328_v61 = vlaneseq (!%p269_p9)  ;;  %s299_s11 = sand.u32 (!%p269_p9), 1, %s2082_s30  }
  0x11   : > { %272 = sbr.rel (%p269_p9) target bundleno = 1045 (0x415), region = 52  ;;  %v325_v2 = vld [vmem:[#allocation2] sm:$0x1] (!%p269_p9)  ;;  %1719 = vmatprep.subr.mxu0 (!%p269_p9), %v735_v1  ;;  %p303_p10 = scmp.lt.s32.totalorder (!%p269_p9), %s1610_s20, 31  ;;  %v988_v6 = vld [vmem:[%s2835_s4 + $0x18] sm:$0xff] (!%p269_p9)  ;;  %v990_v10 = vld [vmem:[%s2835_s4 + $0x28] sm:$0xff] (!%p269_p9) }
  0x12   : > { %v985_v3 = vld [vmem:[%s2835_s4] sm:$0xff] (!%p269_p9)  ;;  %1921 = vpush (!%p269_p9), %v325_v2  ;;  %1720 = vmatpush3.msra.mxu0 (!%p269_p9), %v735_v1  ;;  %v1861_v8 = vpack.c.bf16 (!%p269_p9), %v988_v6, %v987_v5  ;;  %v991_v12 = vld [vmem:[%s2835_s4 + $0x30] sm:$0xff] (!%p269_p9)  ;;  %v992_v13 = vld [vmem:[%s2835_s4 + $0x38] sm:$0xff] (!%p269_p9)  ;;  %v2316_v62 = vshrl.u32 (!%p269_p9), %v328_v61, 7  ;;  %s1637_s14 = sshll.u32 (!%p269_p9), %s2164_s0, 11  ;;  %s2092_s25 = smov (!%p269_p9), [#allocation3]  }
  0x13   : > { %v1857_v7 = vpack.c.bf16 (!%p269_p9), %v986_v4, %v985_v3  ;;  %v989_v9 = vld [vmem:[%s2835_s4 + $0x20] sm:$0xff] (!%p269_p9)  ;;  %v1869_v18 = vpack.c.bf16 (!%p269_p9), %v992_v13, %v991_v12  ;;  %v994_v21 = vld [vmem:[%s2835_s4 + $0x48] sm:$0xff] (!%p269_p9)  ;;  %v995_v25 = vld [vmem:[%s2835_s4 + $0x50] sm:$0xff] (!%p269_p9)  ;;  %s2781_s22 = scalar_lea.hbm (!%p269_p9), %s2839_s8, %s1637_s14  ;;  %s2032_s26 = sshll.u32 (!%p269_p9), %s2092_s25, 4  ;;  %s2033_s26 = int_to_ptr.vmem [resolvable:$false] %s2032_s26 }
  0x14   : > { %v1865_v11 = vpack.c.bf16 (!%p269_p9), %v990_v10, %v989_v9  ;;  %v993_v20 = vld [vmem:[%s2835_s4 + $0x40] sm:$0xff] (!%p269_p9)  ;;  %v996_v26 = vld [vmem:[%s2835_s4 + $0x58] sm:$0xff] (!%p269_p9)  ;;  %v998_v38 = vld [vmem:[%s2835_s4 + $0x68] sm:$0xff] (!%p269_p9)  ;;  %v330_v63 = vadd.s32 (!%p269_p9), 8, %v2316_v62  ;;  %v332_v2 = vadd.s32 (!%p269_p9), 24, %v2316_v62  ;;  %v331_v3 = vadd.s32 (!%p269_p9), 16, %v2316_v62 }
  0x15   : > { %1858 = vmatprep.subr.bf16.mxu1 (!%p269_p9), %v1857_v7  ;;  %v1873_v23 = vpack.c.bf16 (!%p269_p9), %v994_v21, %v993_v20  ;;  %v1877_v28 = vpack.c.bf16 (!%p269_p9), %v996_v26, %v995_v25  ;;  %v997_v37 = vld [vmem:[%s2835_s4 + $0x60] sm:$0xff] (!%p269_p9)  ;;  %v999_v40 = vld [vmem:[%s2835_s4 + $0x70] sm:$0xff] (!%p269_p9)  ;;  %v1000_v41 = vld [vmem:[%s2835_s4 + $0x78] sm:$0xff] (!%p269_p9)  ;;  %v334_v4 = vadd.s32 (!%p269_p9), 40, %v2316_v62  ;;  %v333_v5 = vadd.s32 (!%p269_p9), 32, %v2316_v62 }
  0x16   : > { %1860 = vmatpush3.bf16.msra.mxu1 (!%p269_p9), %v1857_v7  ;;  %v1881_v39 = vpack.c.bf16 (!%p269_p9), %v998_v38, %v997_v37  ;;  %v1885_v42 = vpack.c.bf16 (!%p269_p9), %v1000_v41, %v999_v40  ;;  %v1201_v43 = vld [vmem:[%s2837_s6] sm:$0xff] (!%p269_p9)  ;;  %v1202_v44 = vld [vmem:[%s2837_s6 + $0x8] sm:$0xff] (!%p269_p9)  ;;  %v1203_v45 = vld [vmem:[%s2837_s6 + $0x10] sm:$0xff] (!%p269_p9)  ;;  %v336_v9 = vadd.s32 (!%p269_p9), 56, %v2316_v62  ;;  %v2337_v10 = vand.u32 (!%p269_p9), 127, %v328_v61 }
  0x17   : > { %1862 = vmatprep.subr.bf16.mxu1 (!%p269_p9), %v1861_v8  ;;  %v1889_v46 = vpack.c.bf16 (!%p269_p9), %v1202_v44, %v1201_v43  ;;  %v1204_v47 = vld [vmem:[%s2837_s6 + $0x18] sm:$0xff] (!%p269_p9)  ;;  %v1205_v49 = vld [vmem:[%s2837_s6 + $0x20] sm:$0xff] (!%p269_p9)  ;;  %v1206_v50 = vld [vmem:[%s2837_s6 + $0x28] sm:$0xff] (!%p269_p9)  ;;  %v337_v40 = vadd.s32 (!%p269_p9), 64, %v2316_v62 }
  0x18   : > { %s2863_s20 = smov (!%p303_p10, %s1610_s20), 31  ;;  %v1893_v48 = vpack.c.bf16 %v1204_v47, %v1203_v45  ;;  %v1897_v51 = vpack.c.bf16 %v1206_v50, %v1205_v49  ;;  %v1207_v52 = vld [vmem:[%s2837_s6 + $0x30] sm:$0xff]  ;;  %v1208_v53 = vld [vmem:[%s2837_s6 + $0x38] sm:$0xff]  ;;  %v1209_v55 = vld [vmem:[%s2837_s6 + $0x40] sm:$0xff] }
  0x19   : > { %s1611_s19 = sshll.u32 %s2863_s20, 3  ;;  %1890 = vmatprep.subr.bf16.mxu0 %v1889_v46  ;;  %v1901_v54 = vpack.c.bf16 %v1208_v53, %v1207_v52  ;;  %v1210_v56 = vld [vmem:[%s2837_s6 + $0x48] sm:$0xff]  ;;  %v1211_v58 = vld [vmem:[%s2837_s6 + $0x50] sm:$0xff]  ;;  %v1212_v59 = vld [vmem:[%s2837_s6 + $0x58] sm:$0xff]  ;;  %s1612_s20 = sshll.u32 %s2164_s0, 7 }
  0x1a   : > { %s2216_s23 = scalar_lea.vmem %s2832_s1, %s1611_s19  ;;  %1864 = vmatpush3.bf16.msra.mxu1 %v1861_v8  ;;  %v1905_v57 = vpack.c.bf16 %v1210_v56, %v1209_v55  ;;  %v1909_v60 = vpack.c.bf16 %v1212_v59, %v1211_v58  ;;  %v2320_v0 = vstv %s1612_s20  ;;  %s2790_s0 = scalar_lea.sflag [#allocation4], %s299_s11 }
  0x1b   : > { %v309_v14 = vld [vmem:[%s2216_s23] sm:$0xff]  ;;  %v310_v15 = vld [vmem:[%s2216_s23 + $0x8] sm:$0xff]  ;;  %v311_v16 = vld [vmem:[%s2216_s23 + $0x10] sm:$0xff]  ;;  %1866 = vmatprep.subr.bf16.mxu1 %v1865_v11  ;;  %v2323_v1 = vadd.s32 %v2320_v0, %v330_v63  ;;  %v2331_v7 = vadd.s32 %v2320_v0, %v332_v2  ;;  %v2334_v8 = vadd.s32 %v2320_v0, %v331_v3  ;;  %v2344_v12 = vadd.s32 %v2320_v0, %v2316_v62  ;;  %s2034_s20 = scalar_lea.vmem %s2033_s26, 4096 }
  0x1c   : > { %1721 = vmatprep.mubr.msk.f32.mxu0 %vm743_vm0, %v309_v14  ;;  %v312_v17 = vld [vmem:[%s2216_s23 + $0x18] sm:$0xff]  ;;  %v313_v19 = vld [vmem:[%s2216_s23 + $0x20] sm:$0xff]  ;;  %v314_v22 = vld [vmem:[%s2216_s23 + $0x28] sm:$0xff]  ;;  %v2347_v13 = vadd.s32 %v2320_v0, %v333_v5  ;;  %v335_v14 = vadd.s32 48, %v2316_v62  ;;  %v342_v3 = vadd.s32 104, %v2316_v62 }
  0x1d   : > { %1722 = vmatmul.mubr.msk.f32.vlgmr.msra.gmra.mrb[0].mxu0 %vm743_vm0, %v310_v15  ;;  %v315_v24 = vld [vmem:[%s2216_s23 + $0x30] sm:$0xff]  ;;  %v316_v27 = vld [vmem:[%s2216_s23 + $0x38] sm:$0xff]  ;;  %v317_v29 = vld [vmem:[%s2216_s23 + $0x40] sm:$0xff]  ;;  %v366_v6 = vmul.u32 256, %v2323_v1  ;;  %v365_v21 = vmul.u32 256, %v2344_v12 }
  0x1e   : > { %1724 = vmatprep.mubr.msk.f32.mxu0 %vm743_vm0, %v311_v16  ;;  %1868 = vmatpush3.bf16.msra.mxu1 %v1865_v11  ;;  %v318_v30 = vld [vmem:[%s2216_s23 + $0x48] sm:$0xff]  ;;  %v319_v31 = vld [vmem:[%s2216_s23 + $0x50] sm:$0xff]  ;;  %v320_v32 = vld [vmem:[%s2216_s23 + $0x58] sm:$0xff]  ;;  %v2340_v11 = vadd.s32 %v2320_v0, %v334_v4  ;;  %v368_v16 = vmul.u32 256, %v2331_v7 }
  0x1f   : > { %1870 = vmatprep.subr.bf16.mxu1 %v1869_v18  ;;  %v321_v33 = vld [vmem:[%s2216_s23 + $0x60] sm:$0xff]  ;;  %v322_v34 = vld [vmem:[%s2216_s23 + $0x68] sm:$0xff]  ;;  %v323_v35 = vld [vmem:[%s2216_s23 + $0x70] sm:$0xff]  ;;  %1892 = vmatpush3.bf16.msra.mxu0 %v1889_v46  ;;  %v383_v15 = vadd.s32 %v366_v6, %v2337_v10 }
  0x20   : > { %v324_v36 = vld [vmem:[%s2216_s23 + $0x78] sm:$0xff]  ;;  %1894 = vmatprep.subr.bf16.mxu0 %v1893_v48  ;;  %v370_v20 = vmul.u32 256, %v2340_v11  ;;  %v387_v26 = vadd.s32 %v368_v16, %v2337_v10  ;;  %s1609_s23 = sshll.u32 %s299_s11, 7 }
  0x21   : > { %1725 = vmatmul.mubr.msk.f32.gmra.mrb[2].mxu0 %vm743_vm0, %v312_v17  ;;  %s2746_s13 = scalar_lea.vmem [#allocation3], %s1609_s23 }
  0x22   : > { %1727 = vmatprep.mubr.msk.f32.mxu0 %vm743_vm0, %v313_v19  ;;  %1872 = vmatpush3.bf16.msra.mxu1 %v1869_v18  ;;  %v367_v18 = vmul.u32 256, %v2334_v8  ;;  %v2358_v19 = vadd.s32 %v2320_v0, %v336_v9  ;;  %s1543_s18 = sshll.u32 %s2746_s13, 4  ;;  %s2783_s18 = int_to_ptr.vmem [resolvable:$true] %s1543_s18 }
  0x23   : > { %1874 = vmatprep.subr.bf16.mxu1 %v1873_v23  ;;  %1896 = vmatpush3.bf16.msra.mxu0 %v1893_v48  ;;  %v340_v48 = vadd.s32 88, %v2316_v62  ;;  %s2028_s24 = scalar_lea.vmem %s2783_s18, 2048  ;;  %p2035_p0 = scmp.lt.s32.totalorder %s2783_s18, %s2033_s26 }
  0x24   : > { %1898 = vmatprep.subr.bf16.mxu0 %v1897_v51  ;;  %p2029_p11 = scmp.ne.s32.totalorder %s2783_s18, %s2028_s24  ;;  %p2036_p1 = scmp.lt.s32.totalorder %s2034_s20, %s2028_s24 }
  0x25   : > { %1728 = vmatmul.mubr.msk.f32.gmra.mrb[4].mxu0 %vm743_vm0, %v314_v22  ;;  %v369_v22 = vmul.u32 256, %v2347_v13 }
  0x26   : > { %1730 = vmatprep.mubr.msk.f32.mxu0 %vm743_vm0, %v315_v24  ;;  %1876 = vmatpush3.bf16.msra.mxu1 %v1873_v23  ;;  %v2364_v23 = vadd.s32 %v2320_v0, %v335_v14  ;;  %v338_v24 = vadd.s32 72, %v2316_v62  ;;  %v341_v14 = vadd.s32 96, %v2316_v62  ;;  %p2030_p12 = pnand %p2029_p11, %p2181_p5  ;;  %p2037_p2 = por %p2036_p1, %p2035_p0 }
  0x27   : > { %1878 = vmatprep.subr.bf16.mxu1 %v1877_v28  ;;  %1900 = vmatpush3.bf16.msra.mxu0 %v1897_v51  ;;  %v2404_v51 = vadd.s32 %v2320_v0, %v337_v40 }
  0x28   : > { %1902 = vmatprep.subr.bf16.mxu0 %v1901_v54  ;;  %v2430_v40 = vadd.s32 %v2320_v0, %v341_v14  ;;  %p2031_p13 = pneg %p2030_p12 }
  0x29   : > { %1731 = vmatmul.mubr.msk.f32.gmra.mrb[6].mxu0 %vm743_vm0, %v316_v27  ;;  %v385_v27 = vadd.s32 %v367_v18, %v2337_v10  ;;  %v2846_v2 = vmul.u32 256, %v2404_v51 }
  0x2a   : > { %1733 = vmatprep.mubr.msk.f32.mxu0 %vm743_vm0, %v317_v29  ;;  %1880 = vmatpush3.bf16.msra.mxu1 %v1877_v28  ;;  %v372_v28 = vmul.u32 256, %v2358_v19  ;;  %v391_v29 = vadd.s32 %v370_v20, %v2337_v10  ;;  %p2038_p3 = pnand %p2037_p2, %p2031_p13 }
  0x2b   : > { %1882 = vmatprep.subr.bf16.mxu1 %v1881_v39  ;;  %1904 = vmatpush3.bf16.msra.mxu0 %v1901_v54 }
  0x2c   : > { %1906 = vmatprep.subr.bf16.mxu0 %v1905_v57  ;;  %v395_v37 = vadd.s32 %v372_v28, %v2337_v10 }
  0x2d   : > { %1734 = vmatmul.mubr.msk.f32.gmra.mrb[8].mxu0 %vm743_vm0, %v318_v30  ;;  %v381_v30 = vadd.s32 %v365_v21, %v2337_v10 }
  0x2e   : > { %1736 = vmatprep.mubr.msk.f32.mxu0 %vm743_vm0, %v319_v31  ;;  %1884 = vmatpush3.bf16.msra.mxu1 %v1881_v39  ;;  %v389_v31 = vadd.s32 %v369_v22, %v2337_v10 }
  0x2f   : > { %1886 = vmatprep.subr.bf16.mxu1 %v1885_v42  ;;  %1908 = vmatpush3.bf16.msra.mxu0 %v1905_v57  ;;  %v339_v57 = vadd.s32 80, %v2316_v62 }
  0x30   : > { %1910 = vmatprep.subr.bf16.mxu0 %v1909_v60 }
  0x31   : > { %1737 = vmatmul.mubr.msk.f32.gmra.mrb[10].mxu0 %vm743_vm0, %v320_v32  ;;  %v371_v32 = vmul.u32 256, %v2364_v23 }
  0x32   : > { %1739 = vmatprep.mubr.msk.f32.mxu0 %vm743_vm0, %v321_v33  ;;  %1888 = vmatpush3.bf16.msra.mxu1 %v1885_v42  ;;  %v2386_v33 = vadd.s32 %v2320_v0, %v338_v24 }
  0x33   : > { %1912 = vmatpush3.bf16.msra.mxu0 %v1909_v60  ;;  %v393_v42 = vadd.s32 %v371_v32, %v2337_v10  ;;  %v2412_v60 = vadd.s32 %v2320_v0, %v340_v48 }
  0x34   : > { %v2847_v43 = vmul.u32 256, %v2386_v33  ;;  %v2850_v19 = vmul.u32 256, %v2386_v33 }
  0x35   : > { %1740 = vmatmul.mubr.msk.f32.gmra.mrb[12].mxu0 %vm743_vm0, %v322_v34 }
  0x36   : > { %1742 = vmatprep.mubr.msk.f32.mxu0 %vm743_vm0, %v323_v35  ;;  %v399_v54 = vadd.s32 %v2847_v43, %v2337_v10 }
  0x39   : > { %1743 = vmatmul.mubr.msk.f32.gmra.mrb[14].mxu0 %vm743_vm0, %v324_v36 }
  0x43   : > { %s1922_s27 = spop %1921 }
  0x44   : > { %s413_s28 = smul.u32 2654435769, %s1922_s27 }
  0x46   : > { %v2354_v17 = vstv %s413_s28 }
  0x47   : > { %v417_v25 = vxor.u32 %v2354_v17, %v383_v15  ;;  %v421_v35 = vxor.u32 %v2354_v17, %v387_v26  ;;  %v419_v36 = vxor.u32 %v2354_v17, %v385_v27  ;;  %v425_v38 = vxor.u32 %v2354_v17, %v391_v29 }
  0x48   : > { %v415_v39 = vxor.u32 %v2354_v17, %v381_v30  ;;  %v423_v41 = vxor.u32 %v2354_v17, %v389_v31  ;;  %v429_v47 = vxor.u32 %v2354_v17, %v395_v37  ;;  %v427_v53 = vxor.u32 %v2354_v17, %v393_v42 }
  0x49   : > { %v449_v34 = vshrl.u32 %v417_v25, 16  ;;  %v453_v45 = vshrl.u32 %v421_v35, 16  ;;  %v451_v46 = vshrl.u32 %v419_v36, 16  ;;  %v457_v49 = vshrl.u32 %v425_v38, 16 }
  0x4a   : > { %v447_v50 = vshrl.u32 %v415_v39, 16  ;;  %v455_v52 = vshrl.u32 %v423_v41, 16  ;;  %v461_v59 = vshrl.u32 %v429_v47, 16  ;;  %v459_v5 = vshrl.u32 %v427_v53, 16 }
  0x4b   : > { %v481_v44 = vxor.u32 %v449_v34, %v417_v25  ;;  %v485_v56 = vxor.u32 %v453_v45, %v421_v35  ;;  %v483_v58 = vxor.u32 %v451_v46, %v419_v36  ;;  %v489_v61 = vxor.u32 %v457_v49, %v425_v38 }
  0x4c   : > { %v479_v63 = vxor.u32 %v447_v50, %v415_v39  ;;  %v487_v4 = vxor.u32 %v455_v52, %v423_v41  ;;  %v433_v9 = vxor.u32 %v2354_v17, %v399_v54  ;;  %v2419_v25 = vadd.s32 %v2320_v0, %v339_v57 }
  0x4d   : > { %v513_v55 = vmul.u32 2146121005, %v481_v44  ;;  %v517_v24 = vmul.u32 2146121005, %v485_v56  ;;  %v493_v27 = vxor.u32 %v461_v59, %v429_v47  ;;  %v344_v30 = vadd.s32 120, %v2316_v62 }
  0x4e   : > { %v515_v26 = vmul.u32 2146121005, %v483_v58  ;;  %v2844_v29 = vmul.u32 256, %v2412_v60  ;;  %v397_v35 = vadd.s32 %v2846_v2, %v2337_v10  ;;  %v2427_v36 = vadd.s32 %v2320_v0, %v342_v3 }
  0x4f   : > { %v545_v15 = vshrl.u32 %v513_v55, 15  ;;  %v521_v31 = vmul.u32 2146121005, %v489_v61  ;;  %v511_v34 = vmul.u32 2146121005, %v479_v63  ;;  %v491_v38 = vxor.u32 %v459_v5, %v427_v53 }
  0x50   : > { %v519_v37 = vmul.u32 2146121005, %v487_v4  ;;  %v465_v39 = vshrl.u32 %v433_v9, 16  ;;  %v549_v42 = vshrl.u32 %v517_v24, 15  ;;  %v2842_v44 = vmul.u32 256, %v2419_v25 }
  0x51   : > { %v577_v41 = vxor.u32 %v545_v15, %v513_v55  ;;  %v343_v45 = vadd.s32 112, %v2316_v62  ;;  %v547_v46 = vshrl.u32 %v515_v26, 15  ;;  %v525_v47 = vmul.u32 2146121005, %v493_v27 }
  0x52   : > { %v403_v48 = vadd.s32 %v2844_v29, %v2337_v10  ;;  %v2438_v49 = vadd.s32 %v2320_v0, %v344_v30  ;;  %v553_v50 = vshrl.u32 %v521_v31, 15  ;;  %v543_v52 = vshrl.u32 %v511_v34, 15 }
  0x53   : > { %v431_v53 = vxor.u32 %v2354_v17, %v397_v35  ;;  %v2841_v54 = vmul.u32 256, %v2427_v36  ;;  %v551_v55 = vshrl.u32 %v519_v37, 15  ;;  %v523_v56 = vmul.u32 2146121005, %v491_v38 }
  0x54   : > { %v497_v57 = vxor.u32 %v465_v39, %v433_v9  ;;  %v2840_v62 = vmul.u32 256, %v2430_v40  ;;  %v609_v58 = vmul.u32 2221713035, %v577_v41  ;;  %v581_v59 = vxor.u32 %v549_v42, %v517_v24 }
  0x55   : > { %v401_v61 = vadd.s32 %v2842_v44, %v2337_v10  ;;  %v2447_v63 = vadd.s32 %v2320_v0, %v343_v45  ;;  %v579_v3 = vxor.u32 %v547_v46, %v515_v26  ;;  %v557_v4 = vshrl.u32 %v525_v47, 15 }
  0x56   : > { %v437_v5 = vxor.u32 %v2354_v17, %v403_v48  ;;  %v2843_v14 = vmul.u32 256, %v2438_v49  ;;  %v585_v15 = vxor.u32 %v553_v50, %v521_v31  ;;  %v575_v27 = vxor.u32 %v543_v52, %v511_v34 }
  0x57   : > { %v463_v9 = vshrl.u32 %v431_v53, 16  ;;  %v407_v24 = vadd.s32 %v2841_v54, %v2337_v10  ;;  %v583_v30 = vxor.u32 %v551_v55, %v519_v37  ;;  %v555_v35 = vshrl.u32 %v523_v56, 15 }
  0x58   : > { %v529_v38 = vmul.u32 2146121005, %v497_v57  ;;  %v405_v0 = vadd.s32 %v2840_v62, %v2337_v10  ;;  %v641_v26 = vshrl.u32 %v609_v58, 16  ;;  %v613_v39 = vmul.u32 2221713035, %v581_v59 }
  0x59   : > { %v435_v41 = vxor.u32 %v2354_v17, %v401_v61  ;;  %v2845_v42 = vmul.u32 256, %v2447_v63  ;;  %v611_v31 = vmul.u32 2221713035, %v579_v3  ;;  %v589_v34 = vxor.u32 %v557_v4, %v525_v47 }
  0x5a   : > { %v469_v45 = vshrl.u32 %v437_v5, 16  ;;  %v411_v46 = vadd.s32 %v2843_v14, %v2337_v10  ;;  %v617_v37 = vmul.u32 2221713035, %v585_v15  ;;  %v607_v48 = vmul.u32 2221713035, %v575_v27 }
  0x5b   : > { %v495_v50 = vxor.u32 %v463_v9, %v431_v53  ;;  %v441_v52 = vxor.u32 %v2354_v17, %v407_v24  ;;  %v615_v55 = vmul.u32 2221713035, %v583_v30  ;;  %v587_v57 = vxor.u32 %v555_v35, %v523_v56 }
  0x5c   : > { %v561_v62 = vshrl.u32 %v529_v38, 15  ;;  %v439_v59 = vxor.u32 %v2354_v17, %v405_v0  ;;  %v673_v61 = vxor.u32 %v641_v26, %v609_v58  ;;  %v645_v54 = vshrl.u32 %v613_v39, 16 }
  0x5d   : > { %v467_v44 = vshrl.u32 %v435_v41, 16  ;;  %v409_v47 = vadd.s32 %v2845_v42, %v2337_v10  ;;  %v643_v3 = vshrl.u32 %v611_v31, 16  ;;  %v621_v4 = vmul.u32 2221713035, %v589_v34 }
  0x5e   : > { %v501_v14 = vxor.u32 %v469_v45, %v437_v5  ;;  %v445_v15 = vxor.u32 %v2354_v17, %v411_v46  ;;  %v649_v53 = vshrl.u32 %v617_v37, 16  ;;  %v639_v27 = vshrl.u32 %v607_v48, 16  ;;  %v2474_v5 = vld [vmem:[%s2834_s3] ss:$0 sm:$0xff] }
  0x5f   : > { %v527_v9 = vmul.u32 2146121005, %v495_v50  ;;  %v473_v24 = vshrl.u32 %v441_v52, 16  ;;  %v647_v56 = vshrl.u32 %v615_v55, 16  ;;  %v619_v30 = vmul.u32 2221713035, %v587_v57 }
  0x60   : > { %v2468_v35 = vxor.u32 %v561_v62, %v529_v38  ;;  %v471_v58 = vshrl.u32 %v439_v59, 16  ;;  %vm704_vm1 = vcmp.ge.u32.totalorder %v673_v61, 429496729  ;;  %v677_v0 = vxor.u32 %v645_v54, %v613_v39 }
  0x61   : > { %v499_v26 = vxor.u32 %v467_v44, %v435_v41  ;;  %v443_v29 = vxor.u32 %v2354_v17, %v409_v47  ;;  %v675_v34 = vxor.u32 %v643_v3, %v611_v31  ;;  %v653_v45 = vshrl.u32 %v621_v4, 16 }
  0x62   : > { %v533_v46 = vmul.u32 2146121005, %v501_v14  ;;  %v477_v50 = vshrl.u32 %v445_v15, 16  ;;  %v2476_v42 = vxor.u32 %v649_v53, %v617_v37  ;;  %v671_v57 = vxor.u32 %v639_v27, %v607_v48 }
  0x63   : > { %v559_v62 = vshrl.u32 %v527_v9, 15  ;;  %v505_v38 = vxor.u32 %v473_v24, %v441_v52  ;;  %v2478_v43 = vxor.u32 %v647_v56, %v615_v55  ;;  %v651_v44 = vshrl.u32 %v619_v30, 16 }
  0x64   : > { %v625_v54 = vmul.u32 2221713035, %v2468_v35  ;;  %v503_v39 = vxor.u32 %v471_v58, %v439_v59  ;;  %vm706_vm2 = vcmp.ge.u32.totalorder %v677_v0, 429496729  ;;  %v531_v31 = vmul.u32 2146121005, %v499_v26 }
  0x65   : > { %v475_v3 = vshrl.u32 %v443_v29, 16  ;;  %vm705_vm3 = vcmp.ge.u32.totalorder %v675_v34, 429496729  ;;  %v565_v37 = vshrl.u32 %v533_v46, 15  ;;  %v2483_v48 = vxor.u32 %v477_v50, %v445_v15 }
  0x66   : > { %vm703_vm4 = vcmp.ge.u32.totalorder %v671_v57, 429496729  ;;  %v2485_v55 = vxor.u32 %v559_v62, %v527_v9  ;;  %v537_v53 = vmul.u32 2146121005, %v505_v38  ;;  %vm708_vm5 = vcmp.ge.u32.totalorder %v2476_v42, 429496729 }
  0x67   : > { %v2490_v59 = vxor.u32 %v651_v44, %v619_v30  ;;  %v535_v56 = vmul.u32 2146121005, %v503_v39  ;;  %vm707_vm6 = vcmp.ge.u32.totalorder %v2478_v43, 429496729  ;;  %v563_v26 = vshrl.u32 %v531_v31, 15 }
  0x68   : > { %v507_v9 = vxor.u32 %v475_v3, %v443_v29  ;;  %v2497_v38 = vxor.u32 %v565_v37, %v533_v46  ;;  %v623_v61 = vmul.u32 2221713035, %v2485_v55  ;;  %v569_v44 = vshrl.u32 %v537_v53, 15 }
  0x69   : > { %v567_v29 = vshrl.u32 %v535_v56, 15  ;;  %vm709_vm8 = vcmp.ge.u32.totalorder %v2490_v59, 429496729  ;;  %v595_v37 = vxor.u32 %v563_v26, %v531_v31 }
  0x6a   : > { %v655_v0 = vshrl.u32 %v623_v61, 16 }
  0xf0   : > { %v1723_v2 = vpop.f32.mrb[0].mxu0 }
  0xf1   : > { %v864_v41 = vadd.f32 %v1723_v2, %v2474_v5  ;;  %v858_v47 = vpop.f32.mrb[1].mxu0  ;;  %v2488_v2 = vxor.u32 %v653_v45, %v621_v4  ;;  %v541_v4 = vmul.u32 2146121005, %v2483_v48  ;;  %v539_v48 = vmul.u32 2146121005, %v507_v9 }
  0xf2   : > { %v859_v14 = vadd.f32 %v2474_v5, %v858_v47  ;;  %v627_v9 = vmul.u32 2221713035, %v595_v37 }
  0xf3   : > { %v938_v52 = vmul.f32 1.1111112, %v864_v41  ;;  %vm710_vm7 = vcmp.ge.u32.totalorder %v2488_v2, 429496729 }
  0xf4   : > { %v937_v27 = vmul.f32 1.1111112, %v859_v14  ;;  %v1726_v24 = vpop.f32.mrb[2].mxu0  ;;  %v657_v14 = vshrl.u32 %v625_v54, 16 }
  0xf5   : > { %v954_v35 = vsel %vm704_vm1, %v938_v52, 0.0  ;;  %v874_v58 = vadd.f32 %v1726_v24, %v2474_v5  ;;  %v868_v15 = vpop.f32.mrb[3].mxu0  ;;  %v573_v24 = vshrl.u32 %v541_v4, 15 }
  0xf6   : > { %v869_v50 = vadd.f32 %v2474_v5, %v868_v15  ;;  %v953_v62 = vsel %vm703_vm4, %v937_v27, 0.0  ;;  %v970_v39 = vmax.f32 %v954_v35, 0.0  ;;  %v629_v27 = vmul.u32 2221713035, %v2497_v38 }
  0xf7   : > { %v940_v30 = vmul.f32 1.1111112, %v874_v58  ;;  %v969_v45 = vmax.f32 %v953_v62, 0.0  ;;  %v601_v15 = vxor.u32 %v569_v44, %v537_v53  ;;  %v605_v44 = vxor.u32 %v573_v24, %v541_v4 }
  0xf8   : > { %v939_v41 = vmul.f32 1.1111112, %v869_v50  ;;  %v1729_v47 = vpop.f32.mrb[4].mxu0  ;;  %v661_v53 = vshrl.u32 %v629_v27, 16 }
  0xf9   : > { %v956_v3 = vsel %vm706_vm2, %v940_v30, 0.0  ;;  %v884_v57 = vadd.f32 %v1729_v47, %v2474_v5  ;;  %v878_v46 = vpop.f32.mrb[5].mxu0  ;;  %1777 = vmatprep.mubr.f32.mxu1 %v969_v45  ;;  %v689_v45 = vxor.u32 %v657_v14, %v625_v54  ;;  %v599_v47 = vxor.u32 %v567_v29, %v535_v56 }
  0xfa   : > { %v955_v52 = vsel %vm705_vm3, %v939_v41, 0.0  ;;  %v879_v55 = vadd.f32 %v2474_v5, %v878_v46  ;;  %1778 = vmatmul.mubr.f32.vlgmr.msra.gmra.mrb[0].mxu1 %v970_v39  ;;  %v972_v50 = vmax.f32 %v956_v3, 0.0  ;;  %v571_v39 = vshrl.u32 %v539_v48, 15 }
  0xfb   : > { %v971_v35 = vmax.f32 %v955_v52, 0.0  ;;  %v942_v58 = vmul.f32 1.1111112, %v884_v57  ;;  %v687_v56 = vxor.u32 %v655_v0, %v623_v61  ;;  %v633_v14 = vmul.u32 2221713035, %v601_v15 }
  0xfc   : > { %v941_v62 = vmul.f32 1.1111112, %v879_v55  ;;  %v1732_v30 = vpop.f32.mrb[6].mxu0  ;;  %v631_v46 = vmul.u32 2221713035, %v599_v47  ;;  %v659_v55 = vshrl.u32 %v627_v9, 16  ;;  %v693_v15 = vxor.u32 %v661_v53, %v629_v27 }
  0xfd   : > { %v958_v31 = vsel %vm708_vm5, %v942_v58, 0.0  ;;  %v894_v34 = vadd.f32 %v1732_v30, %v2474_v5  ;;  %v888_v26 = vpop.f32.mrb[7].mxu0  ;;  %1780 = vmatprep.mubr.f32.mxu1 %v971_v35  ;;  %v603_v35 = vxor.u32 %v571_v39, %v539_v48  ;;  %vm712_vm9 = vcmp.ge.u32.totalorder %v689_v45, 429496729 }
  0xfe   : > { %v957_v38 = vsel %vm707_vm6, %v941_v62, 0.0  ;;  %v889_v41 = vadd.f32 %v2474_v5, %v888_v26  ;;  %1781 = vmatmul.mubr.f32.gmra.mrb[2].mxu1 %v972_v50  ;;  %v974_v42 = vmax.f32 %v958_v31, 0.0  ;;  %v637_v24 = vmul.u32 2221713035, %v605_v44 }
  0xff   : > { %v973_v3 = vmax.f32 %v957_v38, 0.0  ;;  %v944_v54 = vmul.f32 1.1111112, %v894_v34  ;;  %vm711_vm10 = vcmp.ge.u32.totalorder %v687_v56, 429496729  ;;  %v665_v30 = vshrl.u32 %v633_v14, 16 }
 0x100   : > { %v943_v29 = vmul.f32 1.1111112, %v889_v41  ;;  %v1735_v57 = vpop.f32.mrb[8].mxu0  ;;  %v663_v47 = vshrl.u32 %v631_v46, 16  ;;  %v691_v34 = vxor.u32 %v659_v55, %v627_v9  ;;  %v635_v45 = vmul.u32 2221713035, %v603_v35 }
 0x101   : > { %v960_v37 = vsel %vm710_vm7, %v944_v54, 0.0  ;;  %v904_v52 = vadd.f32 %v1735_v57, %v2474_v5  ;;  %v898_v43 = vpop.f32.mrb[9].mxu0  ;;  %1783 = vmatprep.mubr.f32.mxu1 %v973_v3  ;;  %vm714_vm11 = vcmp.ge.u32.totalorder %v693_v15, 429496729  ;;  %v669_v27 = vshrl.u32 %v637_v24, 16 }
 0x102   : > { %v959_v4 = vsel %vm709_vm8, %v943_v29, 0.0  ;;  %v899_v61 = vadd.f32 %v2474_v5, %v898_v43  ;;  %1784 = vmatmul.mubr.f32.gmra.mrb[4].mxu1 %v974_v42  ;;  %v976_v2 = vmax.f32 %v960_v37, 0.0  ;;  %v697_v3 = vxor.u32 %v665_v30, %v633_v14 }
 0x103   : > { %v975_v58 = vmax.f32 %v959_v4, 0.0  ;;  %v946_v0 = vmul.f32 1.1111112, %v904_v52  ;;  %v695_v56 = vxor.u32 %v663_v47, %v631_v46  ;;  %vm713_vm12 = vcmp.ge.u32.totalorder %v691_v34, 429496729 }
 0x104   : > { %v945_v50 = vmul.f32 1.1111112, %v899_v61  ;;  %v1738_v62 = vpop.f32.mrb[10].mxu0  ;;  %v667_v57 = vshrl.u32 %v635_v45, 16  ;;  %vm716_vm13 = vcmp.ge.u32.totalorder %v697_v3, 429496729  ;;  %v701_v61 = vxor.u32 %v669_v27, %v637_v24 }
 0x105   : > { %v962_v31 = vsel %vm712_vm9, %v946_v0, 0.0  ;;  %v914_v48 = vadd.f32 %v1738_v62, %v2474_v5  ;;  %v908_v59 = vpop.f32.mrb[11].mxu0  ;;  %1786 = vmatprep.mubr.f32.mxu1 %v975_v58  ;;  %vm715_vm14 = vcmp.ge.u32.totalorder %v695_v56, 429496729  ;;  %v2539_v27 = vadd.s32 128, %v2337_v10 }
 0x106   : > { %v961_v26 = vsel %vm711_vm10, %v945_v50, 0.0  ;;  %v909_v39 = vadd.f32 %v2474_v5, %v908_v59  ;;  %1787 = vmatmul.mubr.f32.gmra.mrb[6].mxu1 %v976_v2  ;;  %v978_v53 = vmax.f32 %v962_v31, 0.0  ;;  %v699_v0 = vxor.u32 %v667_v57, %v635_v45  ;;  %v1213_v45 = vld [vmem:[%s2837_s6 + $0x60] sm:$0xff] }
 0x107   : > { %v977_v38 = vmax.f32 %v961_v26, 0.0  ;;  %v948_v41 = vmul.f32 1.1111112, %v914_v48  ;;  %vm718_vm15 = vcmp.ge.u32.totalorder %v701_v61, 429496729  ;;  %v388_v3 = vadd.s32 %v368_v16, %v2539_v27 }
 0x108   : > { %v947_v44 = vmul.f32 1.1111112, %v909_v39  ;;  %v1741_v54 = vpop.f32.mrb[12].mxu0  ;;  %vm717_vm0 = vcmp.ge.u32.totalorder %v699_v0, 429496729  ;;  %v1215_v39 = vld [vmem:[%s2837_s6 + $0x70] sm:$0xff]  ;;  %v386_v10 = vadd.s32 %v367_v18, %v2539_v27  ;;  %v392_v1 = vadd.s32 %v370_v20, %v2539_v27 }
 0x109   : > { %v964_v42 = vsel %vm714_vm11, %v948_v41, 0.0  ;;  %v924_v9 = vadd.f32 %v1741_v54, %v2474_v5  ;;  %v918_v29 = vpop.f32.mrb[13].mxu0  ;;  %1789 = vmatprep.mubr.f32.mxu1 %v977_v38  ;;  %v1216_v38 = vld [vmem:[%s2837_s6 + $0x78] sm:$0xff]  ;;  %v390_v7 = vadd.s32 %v369_v22, %v2539_v27  ;;  %v396_v8 = vadd.s32 %v372_v28, %v2539_v27 }
 0x10a   : > { %v963_v37 = vsel %vm713_vm12, %v947_v44, 0.0  ;;  %v919_v52 = vadd.f32 %v2474_v5, %v918_v29  ;;  %1790 = vmatmul.mubr.f32.gmra.mrb[8].mxu1 %v978_v53  ;;  %v980_v35 = vmax.f32 %v964_v42, 0.0  ;;  %v1917_v41 = vpack.c.bf16 %v1216_v38, %v1215_v39 }
 0x10b   : > { %v979_v43 = vmax.f32 %v963_v37, 0.0  ;;  %v950_v55 = vmul.f32 1.1111112, %v924_v9  ;;  %v384_v53 = vadd.s32 %v366_v6, %v2539_v27  ;;  %v382_v44 = vadd.s32 %v365_v21, %v2539_v27 }
 0x10c   : > { %v949_v4 = vmul.f32 1.1111112, %v919_v52  ;;  %v1744_v14 = vpop.f32.mrb[14].mxu0  ;;  %v422_v42 = vxor.u32 %v2354_v17, %v388_v3  ;;  %v420_v16 = vxor.u32 %v2354_v17, %v386_v10  ;;  %v426_v18 = vxor.u32 %v2354_v17, %v392_v1 }
 0x10d   : > { %v966_v58 = vsel %vm716_vm13, %v950_v55, 0.0  ;;  %v934_v46 = vadd.f32 %v1744_v14, %v2474_v5  ;;  %v928_v15 = vpop.f32.mrb[15].mxu0  ;;  %1792 = vmatprep.mubr.f32.mxu1 %v979_v43  ;;  %v418_v54 = vxor.u32 %v2354_v17, %v384_v53  ;;  %v416_v56 = vxor.u32 %v2354_v17, %v382_v44 }
 0x10e   : > { %v965_v2 = vsel %vm715_vm14, %v949_v4, 0.0  ;;  %v929_v50 = vadd.f32 %v2474_v5, %v928_v15  ;;  %1793 = vmatmul.mubr.f32.gmra.mrb[10].mxu1 %v980_v35  ;;  %v982_v47 = vmax.f32 %v966_v58, 0.0  ;;  %v1214_v5 = vld [vmem:[%s2837_s6 + $0x68] sm:$0xff]  ;;  %v454_v21 = vshrl.u32 %v422_v42, 16 }
 0x10f   : > { %v981_v62 = vmax.f32 %v965_v2, 0.0  ;;  %v952_v30 = vmul.f32 1.1111112, %v934_v46  ;;  %v1913_v26 = vpack.c.bf16 %v1214_v5, %v1213_v45  ;;  %v450_v6 = vshrl.u32 %v418_v54, 16 }
 0x110   : > { %v951_v31 = vmul.f32 1.1111112, %v929_v50  ;;  %v448_v12 = vshrl.u32 %v416_v56, 16  ;;  %v394_v11 = vadd.s32 %v371_v32, %v2539_v27  ;;  %v424_v9 = vxor.u32 %v2354_v17, %v390_v7 }
 0x111   : > { %v968_v48 = vsel %vm718_vm15, %v952_v30, 0.0  ;;  %1795 = vmatprep.mubr.f32.mxu1 %v981_v62  ;;  %1914 = vmatprep.subr.bf16.mxu0 %v1913_v26  ;;  %v482_v20 = vxor.u32 %v450_v6, %v418_v54  ;;  %v452_v13 = vshrl.u32 %v420_v16, 16  ;;  %v486_v22 = vxor.u32 %v454_v21, %v422_v42 }
 0x112   : > { %v967_v24 = vsel %vm717_vm0, %v951_v31, 0.0  ;;  %1796 = vmatmul.mubr.f32.gmra.mrb[12].mxu1 %v982_v47  ;;  %v984_v59 = vmax.f32 %v968_v48, 0.0  ;;  %1916 = vmatpush3.bf16.msra.mxu0 %v1913_v26  ;;  %v480_v29 = vxor.u32 %v448_v12, %v416_v56  ;;  %v430_v57 = vxor.u32 %v2354_v17, %v396_v8 }
 0x113   : > { %v983_v34 = vmax.f32 %v967_v24, 0.0  ;;  %1918 = vmatprep.subr.bf16.mxu0 %v1917_v41  ;;  %v458_v37 = vshrl.u32 %v426_v18, 16  ;;  %v428_v52 = vxor.u32 %v2354_v17, %v394_v11  ;;  %v400_v28 = vadd.s32 %v2850_v19, %v2539_v27 }
 0x114   : > { %v514_v43 = vmul.u32 2146121005, %v482_v20  ;;  %v456_v55 = vshrl.u32 %v424_v9, 16  ;;  %v512_v35 = vmul.u32 2146121005, %v480_v29  ;;  %v484_v23 = vxor.u32 %v452_v13, %v420_v16 }
 0x115   : > { %1798 = vmatprep.mubr.f32.mxu1 %v983_v34  ;;  %v518_v32 = vmul.u32 2146121005, %v486_v22  ;;  %v462_v4 = vshrl.u32 %v430_v57, 16  ;;  %v490_v61 = vxor.u32 %v458_v37, %v426_v18  ;;  %v460_v14 = vshrl.u32 %v428_v52, 16 }
 0x116   : > { %1799 = vmatmul.mubr.f32.gmra.mrb[14].mxu1 %v984_v59  ;;  %1920 = vmatpush3.bf16.msra.mxu0 %v1917_v41  ;;  %v434_v58 = vxor.u32 %v2354_v17, %v400_v28  ;;  %v546_v46 = vshrl.u32 %v514_v43, 15  ;;  %v488_v0 = vxor.u32 %v456_v55, %v424_v9  ;;  %v544_v15 = vshrl.u32 %v512_v35, 15 }
 0x117   : > { %v516_v2 = vmul.u32 2146121005, %v484_v23  ;;  %v2851_v50 = vmul.u32 256, %v2404_v51  ;;  %v550_v33 = vshrl.u32 %v518_v32, 15  ;;  %v494_v30 = vxor.u32 %v462_v4, %v430_v57 }
 0x118   : > { %v522_v47 = vmul.u32 2146121005, %v490_v61  ;;  %v492_v31 = vxor.u32 %v460_v14, %v428_v52  ;;  %v466_v48 = vshrl.u32 %v434_v58, 16  ;;  %v578_v24 = vxor.u32 %v546_v46, %v514_v43 }
 0x119   : > { %v398_v62 = vadd.s32 %v2851_v50, %v2539_v27  ;;  %v520_v34 = vmul.u32 2146121005, %v488_v0  ;;  %v576_v59 = vxor.u32 %v544_v15, %v512_v35  ;;  %v548_v45 = vshrl.u32 %v516_v2, 15 }
 0x11a   : > { %v2852_v26 = vmul.u32 256, %v2412_v60  ;;  %v582_v38 = vxor.u32 %v550_v33, %v518_v32  ;;  %v526_v41 = vmul.u32 2146121005, %v494_v30  ;;  %v554_v44 = vshrl.u32 %v522_v47, 15 }
 0x11b   : > { %v432_v5 = vxor.u32 %v2354_v17, %v398_v62  ;;  %v2853_v51 = vmul.u32 256, %v2419_v25  ;;  %v524_v3 = vmul.u32 2146121005, %v492_v31  ;;  %v498_v54 = vxor.u32 %v466_v48, %v434_v58 }
 0x11c   : > { %v404_v39 = vadd.s32 %v2852_v26, %v2539_v27  ;;  %v610_v56 = vmul.u32 2221713035, %v578_v24  ;;  %v552_v10 = vshrl.u32 %v520_v34, 15  ;;  %v608_v42 = vmul.u32 2221713035, %v576_v59 }
 0x11d   : > { %v402_v53 = vadd.s32 %v2853_v51, %v2539_v27  ;;  %v580_v1 = vxor.u32 %v548_v45, %v516_v2  ;;  %v464_v6 = vshrl.u32 %v432_v5, 16  ;;  %v614_v12 = vmul.u32 2221713035, %v582_v38 }
 0x11e   : > { %v438_v7 = vxor.u32 %v2354_v17, %v404_v39  ;;  %v558_v16 = vshrl.u32 %v526_v41, 15  ;;  %v2854_v21 = vmul.u32 256, %v2427_v36  ;;  %v586_v25 = vxor.u32 %v554_v44, %v522_v47 }
 0x11f   : > { %v436_v60 = vxor.u32 %v2354_v17, %v402_v53  ;;  %v556_v18 = vshrl.u32 %v524_v3, 15  ;;  %v530_v11 = vmul.u32 2146121005, %v498_v54  ;;  %v642_v20 = vshrl.u32 %v610_v56, 16 }
 0x120   : > { %v408_v8 = vadd.s32 %v2854_v21, %v2539_v27  ;;  %v584_v9 = vxor.u32 %v552_v10, %v520_v34  ;;  %v2855_v29 = vmul.u32 256, %v2430_v40  ;;  %v640_v22 = vshrl.u32 %v608_v42, 16 }
 0x121   : > { %v612_v57 = vmul.u32 2221713035, %v580_v1  ;;  %v496_v37 = vxor.u32 %v464_v6, %v432_v5  ;;  %v470_v52 = vshrl.u32 %v438_v7, 16  ;;  %v646_v19 = vshrl.u32 %v614_v12, 16 }
 0x122   : > { %v406_v13 = vadd.s32 %v2855_v29, %v2539_v27  ;;  %v590_v28 = vxor.u32 %v558_v16, %v526_v41  ;;  %v468_v43 = vshrl.u32 %v436_v60, 16  ;;  %v442_v55 = vxor.u32 %v2354_v17, %v408_v8 }
 0x123   : > { %v618_v36 = vmul.u32 2221713035, %v586_v25  ;;  %v588_v35 = vxor.u32 %v556_v18, %v524_v3  ;;  %v562_v23 = vshrl.u32 %v530_v11, 15  ;;  %v2856_v32 = vmul.u32 256, %v2438_v49 }
 0x124   : > { %v674_v61 = vxor.u32 %v642_v20, %v610_v56  ;;  %v616_v14 = vmul.u32 2221713035, %v584_v9  ;;  %v440_v40 = vxor.u32 %v2354_v17, %v406_v13  ;;  %v2857_v58 = vmul.u32 256, %v2447_v63 }
 0x125   : > { %v412_v4 = vadd.s32 %v2856_v32, %v2539_v27  ;;  %v672_v0 = vxor.u32 %v640_v22, %v608_v42  ;;  %v644_v15 = vshrl.u32 %v612_v57, 16  ;;  %v528_v2 = vmul.u32 2146121005, %v496_v37 }
 0x126   : > { %v410_v46 = vadd.s32 %v2857_v58, %v2539_v27  ;;  %v502_v50 = vxor.u32 %v470_v52, %v438_v7  ;;  %v2603_v62 = vxor.u32 %v646_v19, %v614_v12  ;;  %v622_v33 = vmul.u32 2221713035, %v590_v28  ;;  %v2612_v27 = vld [vmem:[%s2836_s5] ss:$0 sm:$0xff] }
 0x127   : > { %v500_v30 = vxor.u32 %v468_v43, %v436_v60  ;;  %v474_v47 = vshrl.u32 %v442_v55, 16  ;;  %v650_v31 = vshrl.u32 %v618_v36, 16  ;;  %v620_v49 = vmul.u32 2221713035, %v588_v35 }
 0x128   : > { %v2605_v48 = vxor.u32 %v562_v23, %v530_v11  ;;  %v446_v24 = vxor.u32 %v2354_v17, %v412_v4  ;;  %vm720_vm1 = vcmp.ge.u32.totalorder %v674_v61, 429496729  ;;  %v648_v34 = vshrl.u32 %v616_v14, 16 }
 0x129   : > { %v472_v59 = vshrl.u32 %v440_v40, 16  ;;  %v444_v63 = vxor.u32 %v2354_v17, %v410_v46  ;;  %v676_v45 = vxor.u32 %v644_v15, %v612_v57  ;;  %v560_v5 = vshrl.u32 %v528_v2, 15 }
 0x12a   : > { %v534_v26 = vmul.u32 2146121005, %v502_v50  ;;  %vm719_vm2 = vcmp.ge.u32.totalorder %v672_v0, 429496729  ;;  %v654_v39 = vshrl.u32 %v622_v33, 16  ;;  %v506_v41 = vxor.u32 %v474_v47, %v442_v55 }
 0x12b   : > { %v532_v38 = vmul.u32 2146121005, %v500_v30  ;;  %vm722_vm3 = vcmp.ge.u32.totalorder %v2603_v62, 429496729  ;;  %v2615_v53 = vxor.u32 %v650_v31, %v618_v36  ;;  %v652_v44 = vshrl.u32 %v620_v49, 16 }
 0x12c   : > { %v626_v17 = vmul.u32 2221713035, %v2605_v48  ;;  %v478_v3 = vshrl.u32 %v446_v24, 16  ;;  %v2619_v10 = vxor.u32 %v648_v34, %v616_v14  ;;  %v504_v42 = vxor.u32 %v472_v59, %v440_v40 }
 0x12d   : > { %v476_v1 = vshrl.u32 %v444_v63, 16  ;;  %vm721_vm4 = vcmp.ge.u32.totalorder %v676_v45, 429496729  ;;  %v592_v7 = vxor.u32 %v560_v5, %v528_v2  ;;  %v566_v12 = vshrl.u32 %v534_v26, 15 }
 0x12e   : > { %v2622_v60 = vxor.u32 %v654_v39, %v622_v33  ;;  %v564_v21 = vshrl.u32 %v532_v38, 15  ;;  %v538_v8 = vmul.u32 2146121005, %v506_v41  ;;  %vm724_vm5 = vcmp.ge.u32.totalorder %v2615_v53, 429496729 }
 0x12f   : > { %v2625_v11 = vxor.u32 %v652_v44, %v620_v49  ;;  %v658_v20 = vshrl.u32 %v626_v17, 16  ;;  %v510_v9 = vxor.u32 %v478_v3, %v446_v24  ;;  %vm723_vm6 = vcmp.ge.u32.totalorder %v2619_v10, 429496729 }
 0x130   : > { %v536_v57 = vmul.u32 2146121005, %v504_v42  ;;  %v508_v37 = vxor.u32 %v476_v1, %v444_v63  ;;  %v624_v28 = vmul.u32 2221713035, %v592_v7  ;;  %v598_v43 = vxor.u32 %v566_v12, %v534_v26 }
 0x131   : > { %v596_v35 = vxor.u32 %v564_v21, %v532_v38  ;;  %v570_v23 = vshrl.u32 %v538_v8, 15  ;;  %vm726_vm7 = vcmp.ge.u32.totalorder %v2622_v60, 429496729  ;;  %v542_v14 = vmul.u32 2146121005, %v510_v9 }
 0x132   : > { %vm725_vm8 = vcmp.ge.u32.totalorder %v2625_v11, 429496729  ;;  %v568_v0 = vshrl.u32 %v536_v57, 15  ;;  %v540_v15 = vmul.u32 2146121005, %v508_v37  ;;  %v656_v33 = vshrl.u32 %v624_v28, 16 }
 0x133   : > { %v630_v30 = vmul.u32 2221713035, %v598_v43  ;;  %v628_v49 = vmul.u32 2221713035, %v596_v35  ;;  %v602_v62 = vxor.u32 %v570_v23, %v538_v8  ;;  %v690_v59 = vxor.u32 %v658_v20, %v626_v17 }
 0x134   : > { %v574_v63 = vshrl.u32 %v542_v14, 15  ;;  %v600_v39 = vxor.u32 %v568_v0, %v536_v57  ;;  %v572_v38 = vshrl.u32 %v540_v15, 15  ;;  %v688_v44 = vxor.u32 %v656_v33, %v624_v28 }
 0x135   : > { %v662_v3 = vshrl.u32 %v630_v30, 16  ;;  %v634_v42 = vmul.u32 2221713035, %v602_v62  ;;  %vm728_vm9 = vcmp.ge.u32.totalorder %v690_v59, 429496729 }
 0x136   : > { %v606_v7 = vxor.u32 %v574_v63, %v542_v14  ;;  %v632_v21 = vmul.u32 2221713035, %v600_v39  ;;  %v604_v8 = vxor.u32 %v572_v38, %v540_v15  ;;  %vm727_vm10 = vcmp.ge.u32.totalorder %v688_v44, 429496729 }
 0x137   : > { %v694_v20 = vxor.u32 %v662_v3, %v630_v30 }
 0x138   : > { %v664_v11 = vshrl.u32 %v632_v21, 16 }
 0x139   : > { %vm730_vm11 = vcmp.ge.u32.totalorder %v694_v20, 429496729 }
 0x13a   : > { %v696_v15 = vxor.u32 %v664_v11, %v632_v21 }
 0x13c   : > { %vm731_vm14 = vcmp.ge.u32.totalorder %v696_v15, 429496729 }
 0x1cd   : > { %v1779_v51 = vpop.f32.mrb[0].mxu1 }
 0x1ce   : > { %v1080_v54 = vadd.f32 %v1779_v51, %v2612_v27  ;;  %v1074_v56 = vpop.f32.mrb[1].mxu1 }
 0x1cf   : > { %v1075_v6 = vadd.f32 %v2612_v27, %v1074_v56  ;;  %v660_v56 = vshrl.u32 %v628_v49, 16 }
 0x1d0   : > { %v1154_v16 = vmul.f32 1.1111112, %v1080_v54 }
 0x1d1   : > { %v1153_v25 = vmul.f32 1.1111112, %v1075_v6  ;;  %v1782_v18 = vpop.f32.mrb[2].mxu1 }
 0x1d2   : > { %v1170_v29 = vsel %vm720_vm1, %v1154_v16, 0.0  ;;  %v1090_v13 = vadd.f32 %v1782_v18, %v2612_v27  ;;  %v1084_v22 = vpop.f32.mrb[3].mxu1 }
 0x1d3   : > { %v1169_v52 = vsel %vm719_vm2, %v1153_v25, 0.0  ;;  %v1085_v19 = vadd.f32 %v2612_v27, %v1084_v22  ;;  %v1186_v32 = vmax.f32 %v1170_v29, 0.0  ;;  %v666_v22 = vshrl.u32 %v634_v42, 16 }
 0x1d4   : > { %v1185_v55 = vmax.f32 %v1169_v52, 0.0  ;;  %v1156_v36 = vmul.f32 1.1111112, %v1090_v13  ;;  %v692_v13 = vxor.u32 %v660_v56, %v628_v49  ;;  %v638_v52 = vmul.u32 2221713035, %v606_v7 }
 0x1d5   : > { %v1155_v4 = vmul.f32 1.1111112, %v1085_v19  ;;  %v1785_v61 = vpop.f32.mrb[4].mxu1  ;;  %v698_v14 = vxor.u32 %v666_v22, %v634_v42  ;;  %v1631_v56 = vld [vmem:[%s2838_s7] ss:$0 sm:$0xff] }
 0x1d6   : > { %v1172_v40 = vsel %vm722_vm3, %v1156_v36, 0.0  ;;  %v1100_v58 = vadd.f32 %v1785_v61, %v2612_v27  ;;  %v1094_v46 = vpop.f32.mrb[5].mxu1  ;;  %1833 = vmatprep.mubr.f32.mxu0 %v1185_v55  ;;  %v636_v55 = vmul.u32 2221713035, %v604_v8  ;;  %vm729_vm12 = vcmp.ge.u32.totalorder %v692_v13, 429496729 }
 0x1d7   : > { %v1171_v2 = vsel %vm721_vm4, %v1155_v4, 0.0  ;;  %v1095_v50 = vadd.f32 %v2612_v27, %v1094_v46  ;;  %1834 = vmatmul.mubr.f32.vlgmr.msra.gmra.mrb[16].mxu0 %v1186_v32  ;;  %v1188_v48 = vmax.f32 %v1172_v40, 0.0  ;;  %vm732_vm13 = vcmp.ge.u32.totalorder %v698_v14, 429496729 }
 0x1d8   : > { %v1187_v47 = vmax.f32 %v1171_v2, 0.0  ;;  %v1158_v31 = vmul.f32 1.1111112, %v1100_v58  ;;  %v670_v58 = vshrl.u32 %v638_v52, 16 }
 0x1d9   : > { %v1157_v24 = vmul.f32 1.1111112, %v1095_v50  ;;  %v1788_v34 = vpop.f32.mrb[6].mxu1  ;;  %v668_v50 = vshrl.u32 %v636_v55, 16 }
 0x1da   : > { %v1174_v5 = vsel %vm724_vm5, %v1158_v31, 0.0  ;;  %v1110_v45 = vadd.f32 %v1788_v34, %v2612_v27  ;;  %v1104_v26 = vpop.f32.mrb[7].mxu1  ;;  %1836 = vmatprep.mubr.f32.mxu0 %v1187_v47 }
 0x1db   : > { %v1173_v41 = vsel %vm723_vm6, %v1157_v24, 0.0  ;;  %v1105_v51 = vadd.f32 %v2612_v27, %v1104_v26  ;;  %1837 = vmatmul.mubr.f32.gmra.mrb[18].mxu0 %v1188_v48  ;;  %v1190_v53 = vmax.f32 %v1174_v5, 0.0  ;;  %v702_v48 = vxor.u32 %v670_v58, %v638_v52 }
 0x1dc   : > { %v1189_v54 = vmax.f32 %v1173_v41, 0.0  ;;  %v1160_v17 = vmul.f32 1.1111112, %v1110_v45  ;;  %v700_v63 = vxor.u32 %v668_v50, %v636_v55 }
 0x1dd   : > { %v1159_v1 = vmul.f32 1.1111112, %v1105_v51  ;;  %v1791_v6 = vpop.f32.mrb[8].mxu1  ;;  %vm734_vm15 = vcmp.ge.u32.totalorder %v702_v48, 429496729 }
 0x1de   : > { %v1176_v12 = vsel %vm726_vm7, %v1160_v17, 0.0  ;;  %v1120_v10 = vadd.f32 %v1791_v6, %v2612_v27  ;;  %v1114_v16 = vpop.f32.mrb[9].mxu1  ;;  %1839 = vmatprep.mubr.f32.mxu0 %v1189_v54  ;;  %vm733_vm0 = vcmp.ge.u32.totalorder %v700_v63, 429496729 }
 0x1df   : > { %v1175_v25 = vsel %vm725_vm8, %v1159_v1, 0.0  ;;  %v1115_v18 = vadd.f32 %v2612_v27, %v1114_v16  ;;  %1840 = vmatmul.mubr.f32.gmra.mrb[20].mxu0 %v1190_v53  ;;  %v1192_v60 = vmax.f32 %v1176_v12, 0.0 }
 0x1e0   : > { %v1191_v9 = vmax.f32 %v1175_v25, 0.0  ;;  %v1162_v29 = vmul.f32 1.1111112, %v1120_v10 }
 0x1e1   : > { %v1161_v57 = vmul.f32 1.1111112, %v1115_v18  ;;  %v1794_v37 = vpop.f32.mrb[10].mxu1 }
 0x1e2   : > { %v1178_v19 = vsel %vm728_vm9, %v1162_v29, 0.0  ;;  %v1130_v28 = vadd.f32 %v1794_v37, %v2612_v27  ;;  %v1124_v43 = vpop.f32.mrb[11].mxu1  ;;  %1842 = vmatprep.mubr.f32.mxu0 %v1191_v9 }
 0x1e3   : > { %v1177_v36 = vsel %vm727_vm10, %v1161_v57, 0.0  ;;  %v1125_v35 = vadd.f32 %v2612_v27, %v1124_v43  ;;  %1843 = vmatmul.mubr.f32.gmra.mrb[22].mxu0 %v1192_v60  ;;  %v1194_v4 = vmax.f32 %v1178_v19, 0.0 }
 0x1e4   : > { %v1193_v23 = vmax.f32 %v1177_v36, 0.0  ;;  %v1164_v32 = vmul.f32 1.1111112, %v1130_v28 }
 0x1e5   : > { %v1163_v61 = vmul.f32 1.1111112, %v1125_v35  ;;  %v1797_v40 = vpop.f32.mrb[12].mxu1 }
 0x1e6   : > { %v1180_v46 = vsel %vm730_vm11, %v1164_v32, 0.0  ;;  %v1140_v0 = vadd.f32 %v1797_v40, %v2612_v27  ;;  %v1134_v2 = vpop.f32.mrb[13].mxu1  ;;  %1845 = vmatprep.mubr.f32.mxu0 %v1193_v23 }
 0x1e7   : > { %v1179_v33 = vsel %vm729_vm12, %v1163_v61, 0.0  ;;  %v1135_v30 = vadd.f32 %v2612_v27, %v1134_v2  ;;  %1846 = vmatmul.mubr.f32.gmra.mrb[24].mxu0 %v1194_v4  ;;  %v1196_v49 = vmax.f32 %v1180_v46, 0.0 }
 0x1e8   : > { %v1195_v47 = vmax.f32 %v1179_v33, 0.0  ;;  %v1166_v31 = vmul.f32 1.1111112, %v1140_v0 }
 0x1e9   : > { %v1165_v62 = vmul.f32 1.1111112, %v1135_v30  ;;  %v1800_v24 = vpop.f32.mrb[14].mxu1 }
 0x1ea   : > { %v1182_v34 = vsel %vm732_vm13, %v1166_v31, 0.0  ;;  %v1150_v59 = vadd.f32 %v1800_v24, %v2612_v27  ;;  %v1144_v5 = vpop.f32.mrb[15].mxu1  ;;  %1848 = vmatprep.mubr.f32.mxu0 %v1195_v47 }
 0x1eb   : > { %v1181_v45 = vsel %vm731_vm14, %v1165_v62, 0.0  ;;  %v1145_v26 = vadd.f32 %v2612_v27, %v1144_v5  ;;  %1849 = vmatmul.mubr.f32.gmra.mrb[26].mxu0 %v1196_v49  ;;  %v1198_v41 = vmax.f32 %v1182_v34, 0.0 }
 0x1ec   : > { %v1197_v39 = vmax.f32 %v1181_v45, 0.0  ;;  %v1168_v38 = vmul.f32 1.1111112, %v1150_v59 }
 0x1ed   : > { %v1167_v51 = vmul.f32 1.1111112, %v1145_v26 }
 0x1ee   : > { %v1184_v44 = vsel %vm734_vm15, %v1168_v38, 0.0  ;;  %1851 = vmatprep.mubr.f32.mxu0 %v1197_v39 }
 0x1ef   : > { %v1183_v3 = vsel %vm733_vm0, %v1167_v51, 0.0  ;;  %1852 = vmatmul.mubr.f32.gmra.mrb[28].mxu0 %v1198_v41  ;;  %v1200_v17 = vmax.f32 %v1184_v44, 0.0 }
 0x1f0   : > { %v1199_v54 = vmax.f32 %v1183_v3, 0.0 }
 0x1f2   : > { %1854 = vmatprep.mubr.f32.mxu0 %v1199_v54 }
 0x1f3   : > { %1855 = vmatmul.mubr.f32.gmra.mrb[30].mxu0 %v1200_v17 }
 0x2aa   : > { %v1835_v27 = vpop.f32.mrb[16].mxu0 }
 0x2ab   : > { %v1296_v42 = vadd.f32 %v1835_v27, %v1631_v56  ;;  %v1290_v53 = vpop.f32.mrb[17].mxu0 }
 0x2ac   : > { %v1291_v6 = vadd.f32 %v1631_v56, %v1290_v53 }
 0x2ad   : > { %1371 = vmax.xlane.f32.xlu0 %v1296_v42 }
 0x2ae   : > { %v1838_v1 = vpop.f32.mrb[18].mxu0 }
 0x2af   : > { %v1306_v7 = vadd.f32 %v1838_v1, %v1631_v56  ;;  %v1300_v12 = vpop.f32.mrb[19].mxu0 }
 0x2b0   : > { %v1301_v16 = vadd.f32 %v1631_v56, %v1300_v12 }
 0x2b1   : > { %1375 = vmax.xlane.f32.xlu1 %v1306_v7  ;;  %1369 = vmax.xlane.f32.xlu0 %v1291_v6 }
 0x2b2   : > { %v1841_v10 = vpop.f32.mrb[20].mxu0 }
 0x2b3   : > { %v1310_v21 = vpop.f32.mrb[21].mxu0  ;;  %v1316_v18 = vadd.f32 %v1841_v10, %v1631_v56 }
 0x2b4   : > { %v1311_v8 = vadd.f32 %v1631_v56, %v1310_v21 }
 0x2b5   : > { %1373 = vmax.xlane.f32.xlu1 %v1301_v16 }
 0x2b6   : > { %v1844_v25 = vpop.f32.mrb[22].mxu0  ;;  %1377 = vmax.xlane.f32.xlu0 %v1311_v8 }
 0x2b7   : > { %v1320_v20 = vpop.f32.mrb[23].mxu0  ;;  %v1326_v13 = vadd.f32 %v1844_v25, %v1631_v56 }
 0x2b8   : > { %v1321_v9 = vadd.f32 %v1631_v56, %v1320_v20 }
 0x2b9   : > { %1379 = vmax.xlane.f32.xlu1 %v1316_v18 }
 0x2ba   : > { %v1847_v29 = vpop.f32.mrb[24].mxu0  ;;  %1381 = vmax.xlane.f32.xlu0 %v1321_v9 }
 0x2bb   : > { %v1330_v22 = vpop.f32.mrb[25].mxu0  ;;  %v2665_v37 = vadd.f32 %v1847_v29, %v1631_v56 }
 0x2bc   : > { %v2662_v60 = vadd.f32 %v1631_v56, %v1330_v22 }
 0x2bd   : > { %1383 = vmax.xlane.f32.xlu1 %v1326_v13 }
 0x2be   : > { %v1850_v57 = vpop.f32.mrb[26].mxu0  ;;  %1385 = vmax.xlane.f32.xlu0 %v2662_v60 }
 0x2bf   : > { %v1340_v52 = vpop.f32.mrb[27].mxu0  ;;  %v2671_v43 = vadd.f32 %v1850_v57, %v1631_v56 }
 0x2c0   : > { %v2667_v19 = vadd.f32 %v1631_v56, %v1340_v52 }
 0x2c1   : > { %1387 = vmax.xlane.f32.xlu1 %v2665_v37 }
 0x2c2   : > { %v1853_v28 = vpop.f32.mrb[28].mxu0  ;;  %1389 = vmax.xlane.f32.xlu0 %v2667_v19 }
 0x2c3   : > { %v1350_v11 = vpop.f32.mrb[29].mxu0  ;;  %v2677_v35 = vadd.f32 %v1853_v28, %v1631_v56 }
 0x2c4   : > { %v2673_v55 = vadd.f32 %v1631_v56, %v1350_v11 }
 0x2c5   : > { %1391 = vmax.xlane.f32.xlu1 %v2671_v43 }
 0x2c6   : > { %v1856_v36 = vpop.f32.mrb[30].mxu0  ;;  %1393 = vmax.xlane.f32.xlu0 %v2673_v55 }
 0x2c7   : > { %v1360_v23 = vpop.f32.mrb[31].mxu0  ;;  %v2683_v4 = vadd.f32 %v1856_v36, %v1631_v56 }
 0x2c8   : > { %v2679_v32 = vadd.f32 %v1631_v56, %v1360_v23 }
 0x2c9   : > { %1395 = vmax.xlane.f32.xlu1 %v2677_v35 }
 0x2ca   : > { %1397 = vmax.xlane.f32.xlu0 %v2679_v32 }
 0x2cd   : > { %1399 = vmax.xlane.f32.xlu1 %v2683_v4 }
 0x33a   : > { %v1372_v61 = vpop.xlane.xlu0 %1371 }
 0x33b   : > { %v1402_v14 = vsub.f32 %v1296_v42, %v1372_v61 }
 0x33d   : > { %v1419_v40 = vmul.f32 1.442695, %v1402_v14 }
 0x33e   : > { %v1376_v58 = vpop.xlane.xlu1 %1375  ;;  %v1370_v46 = vpop.xlane.xlu0 %1369 }
 0x33f   : > { %1964 = vpow2.f32 %v1419_v40  ;;  %v1404_v0 = vsub.f32 %v1306_v7, %v1376_v58  ;;  %v1401_v15 = vsub.f32 %v1291_v6, %v1370_v46 }
 0x341   : > { %v1423_v2 = vmul.f32 1.442695, %v1404_v0  ;;  %v1417_v50 = vmul.f32 1.442695, %v1401_v15 }
 0x342   : > { %v1374_v33 = vpop.xlane.xlu1 %1373 }
 0x343   : > { %1966 = vpow2.f32 %v1423_v2  ;;  %v1403_v30 = vsub.f32 %v1301_v16, %v1374_v33  ;;  %v1378_v47 = vpop.xlane.xlu0 %1377 }
 0x344   : > { %1968 = vpow2.f32 %v1417_v50  ;;  %v1405_v31 = vsub.f32 %v1311_v8, %v1378_v47 }
 0x345   : > { %v1421_v49 = vmul.f32 1.442695, %v1403_v30 }
 0x346   : > { %v1380_v62 = vpop.xlane.xlu1 %1379  ;;  %v1425_v34 = vmul.f32 1.442695, %v1405_v31 }
 0x347   : > { %1970 = vpow2.f32 %v1421_v49  ;;  %v1406_v48 = vsub.f32 %v1316_v18, %v1380_v62  ;;  %v1382_v24 = vpop.xlane.xlu0 %1381 }
 0x348   : > { %v1407_v59 = vsub.f32 %v1321_v9, %v1382_v24 }
 0x349   : > { %v2686_v63 = vpop.eup %1964  ;;  %v1427_v5 = vmul.f32 1.442695, %v1406_v48 }
 0x34a   : > { %1451 = vadd.xlane.f32.xlu1 %v2686_v63  ;;  %v1384_v45 = vpop.xlane.xlu1 %1383  ;;  %v1429_v38 = vmul.f32 1.442695, %v1407_v59 }
 0x34b   : > { %1972 = vpow2.f32 %v1427_v5  ;;  %v1408_v26 = vsub.f32 %v1326_v13, %v1384_v45  ;;  %v1386_v39 = vpop.xlane.xlu0 %1385 }
 0x34c   : > { %1974 = vpow2.f32 %v1425_v34  ;;  %v1409_v41 = vsub.f32 %v2662_v60, %v1386_v39 }
 0x34d   : > { %v2690_v51 = vpop.eup %1966  ;;  %v1431_v44 = vmul.f32 1.442695, %v1408_v26 }
 0x34e   : > { %v2692_v3 = vpop.eup %1968  ;;  %1455 = vadd.xlane.f32.xlu1 %v2690_v51  ;;  %v1388_v54 = vpop.xlane.xlu1 %1387  ;;  %v1433_v27 = vmul.f32 1.442695, %v1409_v41 }
 0x34f   : > { %1976 = vpow2.f32 %v1431_v44  ;;  %v1410_v17 = vsub.f32 %v2665_v37, %v1388_v54  ;;  %1449 = vadd.xlane.f32.xlu0 %v2692_v3  ;;  %v1390_v56 = vpop.xlane.xlu0 %1389 }
 0x350   : > { %1978 = vpow2.f32 %v1429_v38  ;;  %v1411_v42 = vsub.f32 %v2667_v19, %v1390_v56 }
 0x351   : > { %v2698_v53 = vpop.eup %1970  ;;  %v1435_v1 = vmul.f32 1.442695, %v1410_v17 }
 0x352   : > { %v1392_v6 = vpop.xlane.xlu1 %1391  ;;  %v1437_v10 = vmul.f32 1.442695, %v1411_v42 }
 0x353   : > { %1980 = vpow2.f32 %v1435_v1  ;;  %v1412_v7 = vsub.f32 %v2671_v43, %v1392_v6  ;;  %1453 = vadd.xlane.f32.xlu0 %v2698_v53  ;;  %v1394_v12 = vpop.xlane.xlu0 %1393 }
 0x354   : > { %1982 = vpow2.f32 %v1433_v27  ;;  %v1413_v16 = vsub.f32 %v2673_v55, %v1394_v12 }
 0x355   : > { %v2703_v21 = vpop.eup %1972  ;;  %v1439_v8 = vmul.f32 1.442695, %v1412_v7 }
 0x356   : > { %v2705_v25 = vpop.eup %1974  ;;  %1459 = vadd.xlane.f32.xlu1 %v2703_v21  ;;  %v1396_v18 = vpop.xlane.xlu1 %1395  ;;  %v1441_v29 = vmul.f32 1.442695, %v1413_v16 }
 0x357   : > { %1984 = vpow2.f32 %v1439_v8  ;;  %v1414_v20 = vsub.f32 %v2677_v35, %v1396_v18  ;;  %1457 = vadd.xlane.f32.xlu0 %v2705_v25  ;;  %v1398_v9 = vpop.xlane.xlu0 %1397 }
 0x358   : > { %1986 = vpow2.f32 %v1437_v10  ;;  %v1415_v13 = vsub.f32 %v2679_v32, %v1398_v9 }
 0x359   : > { %v2711_v22 = vpop.eup %1976  ;;  %v1443_v60 = vmul.f32 1.442695, %v1414_v20 }
 0x35a   : > { %v2713_v57 = vpop.eup %1978  ;;  %1463 = vadd.xlane.f32.xlu1 %v2711_v22  ;;  %v1400_v37 = vpop.xlane.xlu1 %1399  ;;  %v1445_v19 = vmul.f32 1.442695, %v1415_v13 }
 0x35b   : > { %1988 = vpow2.f32 %v1443_v60  ;;  %v1416_v52 = vsub.f32 %v2683_v4, %v1400_v37  ;;  %1461 = vadd.xlane.f32.xlu0 %v2713_v57 }
 0x35c   : > { %1990 = vpow2.f32 %v1441_v29 }
 0x35d   : > { %v2718_v28 = vpop.eup %1980  ;;  %v1447_v43 = vmul.f32 1.442695, %v1416_v52 }
 0x35e   : > { %v2720_v11 = vpop.eup %1982  ;;  %1467 = vadd.xlane.f32.xlu1 %v2718_v28 }
 0x35f   : > { %1992 = vpow2.f32 %v1447_v43  ;;  %1465 = vadd.xlane.f32.xlu0 %v2720_v11 }
 0x360   : > { %1994 = vpow2.f32 %v1445_v19 }
 0x361   : > { %v2724_v55 = vpop.eup %1984 }
 0x362   : > { %v2726_v36 = vpop.eup %1986  ;;  %1471 = vadd.xlane.f32.xlu1 %v2724_v55 }
 0x363   : > { %1469 = vadd.xlane.f32.xlu0 %v2726_v36 }
 0x365   : > { %v2730_v35 = vpop.eup %1988 }
 0x366   : > { %v2732_v23 = vpop.eup %1990  ;;  %1475 = vadd.xlane.f32.xlu1 %v2730_v35 }
 0x367   : > { %1473 = vadd.xlane.f32.xlu0 %v2732_v23 }
 0x369   : > { %v2736_v32 = vpop.eup %1992 }
 0x36a   : > { %v2738_v4 = vpop.eup %1994  ;;  %1479 = vadd.xlane.f32.xlu1 %v2736_v32 }
 0x36b   : > { %1477 = vadd.xlane.f32.xlu0 %v2738_v4 }
 0x3d7   : > { %v1452_v61 = vpop.xlane.xlu1 %1451 }
 0x3d8   : > { %1996 = vrcp.f32 %v1452_v61 }
 0x3db   : > { %v1456_v14 = vpop.xlane.xlu1 %1455 }
 0x3dc   : > { %1998 = vrcp.f32 %v1456_v14  ;;  %v1450_v40 = vpop.xlane.xlu0 %1449 }
 0x3dd   : > { %2000 = vrcp.f32 %v1450_v40 }
 0x3e0   : > { %v1454_v58 = vpop.xlane.xlu0 %1453 }
 0x3e1   : > { %2002 = vrcp.f32 %v1454_v58 }
 0x3e2   : > { %v1997_v46 = vpop.eup %1996 }
 0x3e3   : > { %v1484_v0 = vmul.f32 %v1997_v46, %v2686_v63  ;;  %v1460_v15 = vpop.xlane.xlu1 %1459 }
 0x3e4   : > { %2004 = vrcp.f32 %v1460_v15  ;;  %v1458_v2 = vpop.xlane.xlu0 %1457 }
 0x3e5   : > { %1514 = vst [vmem:[%s2746_s13 + $0x8] sm:$0xff] %v1484_v0  ;;  %2006 = vrcp.f32 %v1458_v2 }
 0x3e6   : > { %v1999_v50 = vpop.eup %1998 }
 0x3e7   : > { %v2001_v33 = vpop.eup %2000  ;;  %v1488_v30 = vmul.f32 %v1999_v50, %v2690_v51  ;;  %v1464_v47 = vpop.xlane.xlu1 %1463 }
 0x3e8   : > { %v1482_v31 = vmul.f32 %v2001_v33, %v2692_v3  ;;  %2008 = vrcp.f32 %v1464_v47  ;;  %v1462_v49 = vpop.xlane.xlu0 %1461 }
 0x3e9   : > { %1516 = vst [vmem:[%s2746_s13 + $0x18] sm:$0xff] %v1488_v30  ;;  %2010 = vrcp.f32 %v1462_v49 }
 0x3ea   : > { %1513 = vst [vmem:[%s2746_s13] sm:$0xff] %v1482_v31 }
 0x3eb   : > { %v2003_v62 = vpop.eup %2002  ;;  %v1468_v48 = vpop.xlane.xlu1 %1467 }
 0x3ec   : > { %v1486_v24 = vmul.f32 %v2003_v62, %v2698_v53  ;;  %2012 = vrcp.f32 %v1468_v48  ;;  %v1466_v34 = vpop.xlane.xlu0 %1465 }
 0x3ed   : > { %2014 = vrcp.f32 %v1466_v34 }
 0x3ee   : > { %v2005_v59 = vpop.eup %2004  ;;  %1515 = vst [vmem:[%s2746_s13 + $0x10] sm:$0xff] %v1486_v24 }
 0x3ef   : > { %v2007_v63 = vpop.eup %2006  ;;  %v1492_v5 = vmul.f32 %v2005_v59, %v2703_v21  ;;  %v1472_v45 = vpop.xlane.xlu1 %1471 }
 0x3f0   : > { %v1490_v26 = vmul.f32 %v2007_v63, %v2705_v25  ;;  %2016 = vrcp.f32 %v1472_v45  ;;  %v1470_v39 = vpop.xlane.xlu0 %1469 }
 0x3f1   : > { %1518 = vst [vmem:[%s2746_s13 + $0x28] sm:$0xff] %v1492_v5  ;;  %2018 = vrcp.f32 %v1470_v39 }
 0x3f2   : > { %v2009_v38 = vpop.eup %2008  ;;  %1517 = vst [vmem:[%s2746_s13 + $0x20] sm:$0xff] %v1490_v26 }
 0x3f3   : > { %v2011_v41 = vpop.eup %2010  ;;  %v1496_v51 = vmul.f32 %v2009_v38, %v2711_v22  ;;  %v1476_v44 = vpop.xlane.xlu1 %1475 }
 0x3f4   : > { %v1494_v3 = vmul.f32 %v2011_v41, %v2713_v57  ;;  %2020 = vrcp.f32 %v1476_v44  ;;  %v1474_v54 = vpop.xlane.xlu0 %1473 }
 0x3f5   : > { %1520 = vst [vmem:[%s2746_s13 + $0x38] sm:$0xff] %v1496_v51  ;;  %2022 = vrcp.f32 %v1474_v54 }
 0x3f6   : > { %v2013_v17 = vpop.eup %2012  ;;  %1519 = vst [vmem:[%s2746_s13 + $0x30] sm:$0xff] %v1494_v3 }
 0x3f7   : > { %v2015_v56 = vpop.eup %2014  ;;  %v1500_v27 = vmul.f32 %v2013_v17, %v2718_v28  ;;  %v1480_v42 = vpop.xlane.xlu1 %1479 }
 0x3f8   : > { %v1498_v53 = vmul.f32 %v2015_v56, %v2720_v11  ;;  %2024 = vrcp.f32 %v1480_v42  ;;  %v1478_v1 = vpop.xlane.xlu0 %1477 }
 0x3f9   : > { %1522 = vst [vmem:[%s2746_s13 + $0x48] sm:$0xff] %v1500_v27  ;;  %2026 = vrcp.f32 %v1478_v1 }
 0x3fa   : > { %v2017_v6 = vpop.eup %2016  ;;  %1521 = vst [vmem:[%s2746_s13 + $0x40] sm:$0xff] %v1498_v53 }
 0x3fb   : > { %v2019_v7 = vpop.eup %2018  ;;  %v1504_v12 = vmul.f32 %v2017_v6, %v2724_v55 }
 0x3fc   : > { %v1502_v10 = vmul.f32 %v2019_v7, %v2726_v36 }
 0x3fd   : > { %1524 = vst [vmem:[%s2746_s13 + $0x58] sm:$0xff] %v1504_v12 }
 0x3fe   : > { %v2021_v16 = vpop.eup %2020  ;;  %1523 = vst [vmem:[%s2746_s13 + $0x50] sm:$0xff] %v1502_v10 }
 0x3ff   : > { %v2023_v21 = vpop.eup %2022  ;;  %v1508_v8 = vmul.f32 %v2021_v16, %v2730_v35 }
 0x400   : > { %v1506_v25 = vmul.f32 %v2023_v21, %v2732_v23 }
 0x401   : > { %1526 = vst [vmem:[%s2746_s13 + $0x68] sm:$0xff] %v1508_v8 }
 0x402   : > { %v2025_v18 = vpop.eup %2024  ;;  %1525 = vst [vmem:[%s2746_s13 + $0x60] sm:$0xff] %v1506_v25 }
 0x403   : > { %v2027_v20 = vpop.eup %2026  ;;  %v1512_v9 = vmul.f32 %v2025_v18, %v2736_v32 }
 0x404   : > { %v1510_v29 = vmul.f32 %v2027_v20, %v2738_v4 }
 0x405   : > { %1528 = vst [vmem:[%s2746_s13 + $0x78] sm:$0xff] %v1512_v9 }
 0x406   : > { %1527 = vst [vmem:[%s2746_s13 + $0x70] sm:$0xff] %v1510_v29 }
 0x407   : > { %2041 = shalt.err (!%p2038_p3)
}
 0x408   : > { %s2042_s27 = scalar_lea.hbm %s2781_s22, 2048  ;;  %s2046_s23 = scalar_lea.hbm %s2839_s8, 4096 }
 0x409   : > { %p2043_p4 = scmp.ne.s32.totalorder %s2781_s22, %s2042_s27  ;;  %p2047_p9 = scmp.lt.u32.totalorder %s2781_s22, %s2839_s8 }
 0x40a   : > { %p2048_p10 = scmp.lt.u32.totalorder %s2046_s23, %s2042_s27  ;;  %p2050_p12 = scmp.lt.u32.totalorder %s2042_s27, %s2781_s22 }
 0x40b   : > { %p2044_p7 = pnand %p2043_p4, %p2181_p5 }
 0x40c   : > { %p2049_p11 = por %p2048_p10, %p2047_p9 }
 0x40d   : > { %p2045_p8 = pneg %p2044_p7 }
 0x40e   : > { %p2051_p13 = por %p2050_p12, %p2049_p11 }
 0x410   : > { %p2052_p0 = pnand %p2051_p13, %p2045_p8 }
 0x412   : > { %2055 = shalt.err (!%p2052_p0)
}
 0x413   : > { %s2093_s19 = smov 128   ;;  %s2094_s21 = smov 8  }
 0x414   : > { %1923 = dma.vmem_to_hbm [thread:$0]  (%p2181_p5), %s2783_s18, 2048, %s2781_s22, %s2790_s0, %s2093_s19, %s2093_s19, %s2094_s21  }
 0x415 PF: > { %p1929_p1 = scmp.ge.s32.totalorder %s2090_s10, 2  ;;  %s1558_s24 = sand.u32 1, %s2078_s29  }
 0x416   : > { %s1559_s25 = scalar_lea.sflag [#allocation4], %s1558_s24 }
 0x417   : > { %p1926_p2 = pnand %p1929_p1, %p2185_p6 }
 0x419   : > { %2073 = dma.done.wait (!%p1926_p2), %s1559_s25, 2048  }
 0x41a   : > { %2075 = vsyncadd (!%p1926_p2), %s1559_s25, 4294965248  ;;  %p20_p3 = scmp.ge.s32.totalorder %s2168_s12, 4   ;;  %s2858_s29 = smov %s2082_s30 }
 0x41b   : > { %s2859_s30 = smov %s2086_s9  ;;  %s2860_s9 = smov %s2179_s15 }
 0x41c   : > { %s2861_s10 = smov %s2168_s12  ;;  %22 = sbr.rel (!%p20_p3) target bundleno = 6 (0x6), region = 87 }
 0x423   :  { %1564 = vsyncpa [#allocation4], 1 }
 0x424   :  { %1566 = vsyncpa [#allocation4 + $0x1], 1 }

</bundles_post_ra>
